<compile_context>
chip_gen: v7x
topology: tpu7x:2x2x1
jax: 0.10.0
libtpu: 0.0.40
codegen_flags: <defaults>
</compile_context>

<pallas_src>
import jax
import jax.numpy as jnp
import numpy as np
from jax.experimental import pallas as pl
from jax.experimental.pallas import tpu as pltpu

# ----- small config (tie_weights => HI_DIM == EM_DIM) -----
VOCAB = 64
EM_DIM = 32
HI_DIM = 32
N_LAYERS = 2
SEQ_LEN = 8
G = 4 * HI_DIM          # packed gate width: i|f|g|o in 32-lane sub-blocks = 128


def rnnlm_kernel(ids_ref, enc_w_ref, w_ih0_ref, w_hh0_ref, w_cat_ref, b_ref,
                 h0_ref, c0_ref, dec_w_ref, dec_b_ref,
                 logits_ref, hn_ref, cn_ref):
    """Embedding gather + full LSTM recurrence (all layers/steps) + decoder."""
    H = HI_DIM

    def lstm_cell(gates, c):
        # 2 EUP passes over the packed (1,128) gate vector + 1 for tanh(c)
        sig = jax.nn.sigmoid(gates)
        tnh = jnp.tanh(gates)
        i_g = sig[:, 0 * H:1 * H]          # PyTorch gate order: i, f, g, o
        f_g = sig[:, 1 * H:2 * H]
        g_g = tnh[:, 2 * H:3 * H]
        o_g = sig[:, 3 * H:4 * H]
        c = f_g * c + i_g * g_g
        h = o_g * jnp.tanh(c)
        return h, c

    # ---- embedding gather: ids in SMEM, compact (VOCAB, EM_DIM) table ----
    rows = [enc_w_ref[pl.ds(ids_ref[t], 1), :] for t in range(SEQ_LEN)]
    x_emb = jnp.concatenate(rows, axis=0)                    # (SEQ_LEN, EM)

    # ---- layer 0: input-weight matmul hoisted (embedding known up front) ----
    w_hh0 = w_hh0_ref[...]                                   # (H, 4H)
    b0 = b_ref[pl.ds(0, 1), :]                               # (1, 4H)
    xg0 = jnp.dot(x_emb, w_ih0_ref[...],
                  preferred_element_type=jnp.float32) + b0   # (SEQ_LEN, 4H)
    h = h0_ref[pl.ds(0, 1), :]                               # (1, H)
    c = c0_ref[pl.ds(0, 1), :]                               # (1, H)
    xs = []
    for t in range(SEQ_LEN):                                 # fully unrolled
        gates = xg0[t:t + 1, :] + jnp.dot(
            h, w_hh0, preferred_element_type=jnp.float32)    # (1, 4H)
        h, c = lstm_cell(gates, c)
        xs.append(h)
    hn_ref[pl.ds(0, 1), :] = h
    cn_ref[pl.ds(0, 1), :] = c

    # ---- layers >= 1: W_ih folded into the recurrence (wavefront across
    # layers: step t here needs only step t of the previous layer). ----
    for l in range(1, N_LAYERS):
        w_cat = w_cat_ref[l - 1]                             # (2H, 4H)
        bl = b_ref[pl.ds(l, 1), :]                           # (1, 4H)
        h = h0_ref[pl.ds(l, 1), :]
        c = c0_ref[pl.ds(l, 1), :]
        ys = []
        for t in range(SEQ_LEN):                             # fully unrolled
            lhs = jnp.concatenate([xs[t], h], axis=1)        # (1, 2H)
            gates = jnp.dot(lhs, w_cat,
                            preferred_element_type=jnp.float32) + bl
            h, c = lstm_cell(gates, c)
            ys.append(h)
        xs = ys
        hn_ref[pl.ds(l, 1), :] = h
        cn_ref[pl.ds(l, 1), :] = c

    # ---- decoder (tied weight, pre-transposed): (SEQ, H) x (H, V) ----
    x_top = jnp.concatenate(xs, axis=0)                      # (SEQ_LEN, H)
    logits_ref[...] = (jnp.dot(x_top, dec_w_ref[...],
                               preferred_element_type=jnp.float32)
                       + dec_b_ref[...])


@jax.jit
def rnnlm_forward(inputs, hidden, params):
    enc_w, w_ih0, w_hh0, w_cat, bias, dec_w, dec_b = params
    h0, c0 = hidden                                          # (L, 1, H)

    smem = pl.BlockSpec(memory_space=pltpu.MemorySpace.SMEM)
    vmem = pl.BlockSpec(memory_space=pltpu.MemorySpace.VMEM)
    logits, hn, cn = pl.pallas_call(
        rnnlm_kernel,
        out_shape=(
            jax.ShapeDtypeStruct((SEQ_LEN, VOCAB), jnp.float32),
            jax.ShapeDtypeStruct((N_LAYERS, HI_DIM), jnp.float32),
            jax.ShapeDtypeStruct((N_LAYERS, HI_DIM), jnp.float32),
        ),
        in_specs=[smem] + [vmem] * 9,
        out_specs=(vmem, vmem, vmem),
    )(inputs.astype(jnp.int32), enc_w, w_ih0, w_hh0, w_cat, bias,
      h0[:, 0, :], c0[:, 0, :], dec_w, dec_b)

    return logits, (hn[:, None, :], cn[:, None, :])


def build_params(enc_w, w_ih_T, w_hh_T, bias, dec_w, dec_b):
    """All compact; layers >= 1 get [W_ih; W_hh] stacked along K."""
    w_ih0 = jnp.asarray(w_ih_T[0], jnp.float32)              # (EM, 4H)
    w_hh0 = jnp.asarray(w_hh_T[0], jnp.float32)              # (H, 4H)
    w_cat = jnp.concatenate([w_ih_T[1:], w_hh_T[1:]], axis=1)  # (L-1, 2H, 4H)
    return (jnp.asarray(enc_w, jnp.float32), w_ih0, w_hh0,
            jnp.asarray(w_cat, jnp.float32), jnp.asarray(bias, jnp.float32),
            jnp.asarray(dec_w, jnp.float32), jnp.asarray(dec_b, jnp.float32))


# -------------- pure-JAX reference (PyTorch LSTM semantics) --------------
def rnnlm_reference(inputs, h0, c0, enc_w, w_ih_T, w_hh_T, bias, dec_w, dec_b):
    x = enc_w[inputs]
    hn, cn = [], []
    for l in range(N_LAYERS):
        h, c = h0[l:l + 1], c0[l:l + 1]
        outs = []
        for t in range(SEQ_LEN):
            g = x[t:t + 1] @ w_ih_T[l] + h @ w_hh_T[l] + bias[l:l + 1]
            i = jax.nn.sigmoid(g[:, :HI_DIM])
            f = jax.nn.sigmoid(g[:, HI_DIM:2 * HI_DIM])
            gg = jnp.tanh(g[:, 2 * HI_DIM:3 * HI_DIM])
            o = jax.nn.sigmoid(g[:, 3 * HI_DIM:])
            c = f * c + i * gg
            h = o * jnp.tanh(c)
            outs.append(h)
        x = jnp.concatenate(outs, 0)
        hn.append(h)
        cn.append(c)
    return x @ dec_w + dec_b, jnp.concatenate(hn, 0), jnp.concatenate(cn, 0)


if __name__ == "__main__":
    key = jax.random.PRNGKey(0)
    k_enc, k_ih, k_hh, k_bih, k_bhh, k_in = jax.random.split(key, 6)

    # init_weights(): encoder uniform(-0.1, 0.1); decoder tied; decoder bias 0.
    enc_w = jax.random.uniform(k_enc, (VOCAB, EM_DIM), jnp.float32, -0.1, 0.1)
    dec_w = enc_w.T                                          # (H, VOCAB), tied
    dec_b = jnp.zeros((1, VOCAB), jnp.float32)

    # LSTM weights, PyTorch-style uniform(-1/sqrt(H), 1/sqrt(H)), transposed.
    bound = 1.0 / float(np.sqrt(HI_DIM))
    w_ih_T = jax.random.uniform(k_ih, (N_LAYERS, EM_DIM, 4 * HI_DIM),
                                jnp.float32, -bound, bound)
    w_hh_T = jax.random.uniform(k_hh, (N_LAYERS, HI_DIM, 4 * HI_DIM),
                                jnp.float32, -bound, bound)
    b_ih = jax.random.uniform(k_bih, (N_LAYERS, 4 * HI_DIM), jnp.float32,
                              -bound, bound)
    b_hh = jax.random.uniform(k_bhh, (N_LAYERS, 4 * HI_DIM), jnp.float32,
                              -bound, bound)
    bias = b_ih + b_hh

    params = build_params(enc_w, w_ih_T, w_hh_T, bias, dec_w, dec_b)

    # inputs: token ids (seq_len,); hidden: init_hidden() zeros for LSTM.
    inputs = jax.random.randint(k_in, (SEQ_LEN,), 0, VOCAB, dtype=jnp.int32)
    hidden = (jnp.zeros((N_LAYERS, 1, HI_DIM), jnp.float32),
              jnp.zeros((N_LAYERS, 1, HI_DIM), jnp.float32))

    logits, (hn, cn) = rnnlm_forward(inputs, hidden, params)
    jax.block_until_ready((logits, hn, cn))

    ref_logits, ref_hn, ref_cn = rnnlm_reference(
        inputs, hidden[0][:, 0, :], hidden[1][:, 0, :],
        enc_w, w_ih_T, w_hh_T, bias, dec_w, dec_b)

    assert logits.shape == (SEQ_LEN, VOCAB)
    assert hn.shape == (N_LAYERS, 1, HI_DIM) and cn.shape == (N_LAYERS, 1, HI_DIM)
    np.testing.assert_allclose(np.asarray(logits), np.asarray(ref_logits),
                               rtol=1e-4, atol=1e-5)
    np.testing.assert_allclose(np.asarray(hn)[:, 0, :], np.asarray(ref_hn),
                               rtol=1e-4, atol=1e-5)
    np.testing.assert_allclose(np.asarray(cn)[:, 0, :], np.asarray(ref_cn),
                               rtol=1e-4, atol=1e-5)
    print("KERNEL_OK")
</pallas_src>

<mosaic_0001>
module attributes {stable_mosaic.version = 11 : i64} {
  func.func @rnnlm_kernel(%arg0: memref<8xi32, #tpu.memory_space<smem>>, %arg1: memref<64x32xf32, #tpu.memory_space<vmem>>, %arg2: memref<32x128xf32, #tpu.memory_space<vmem>>, %arg3: memref<32x128xf32, #tpu.memory_space<vmem>>, %arg4: memref<1x64x128xf32, #tpu.memory_space<vmem>>, %arg5: memref<2x128xf32, #tpu.memory_space<vmem>>, %arg6: memref<2x32xf32, #tpu.memory_space<vmem>>, %arg7: memref<2x32xf32, #tpu.memory_space<vmem>>, %arg8: memref<32x64xf32, #tpu.memory_space<vmem>>, %arg9: memref<1x64xf32, #tpu.memory_space<vmem>>, %arg10: memref<8x64xf32, #tpu.memory_space<vmem>>, %arg11: memref<2x32xf32, #tpu.memory_space<vmem>>, %arg12: memref<2x32xf32, #tpu.memory_space<vmem>>) attributes {dimension_semantics = [], scalar_prefetch = 0 : i64, scratch_operands = 0 : i64, tpu.core_type = #tpu.core_type<tc>} {
    %c0 = arith.constant 0 : index
    %0 = memref.load %arg0[%c0] : memref<8xi32, #tpu.memory_space<smem>>
    %1 = arith.index_cast %0 : i32 to index
    %c0_0 = arith.constant 0 : index
    %2 = vector.load %arg1[%1, %c0_0] : memref<64x32xf32, #tpu.memory_space<vmem>>, vector<1x32xf32>
    %c1 = arith.constant 1 : index
    %3 = memref.load %arg0[%c1] : memref<8xi32, #tpu.memory_space<smem>>
    %4 = arith.index_cast %3 : i32 to index
    %c0_1 = arith.constant 0 : index
    %5 = vector.load %arg1[%4, %c0_1] : memref<64x32xf32, #tpu.memory_space<vmem>>, vector<1x32xf32>
    %c2 = arith.constant 2 : index
    %6 = memref.load %arg0[%c2] : memref<8xi32, #tpu.memory_space<smem>>
    %7 = arith.index_cast %6 : i32 to index
    %c0_2 = arith.constant 0 : index
    %8 = vector.load %arg1[%7, %c0_2] : memref<64x32xf32, #tpu.memory_space<vmem>>, vector<1x32xf32>
    %c3 = arith.constant 3 : index
    %9 = memref.load %arg0[%c3] : memref<8xi32, #tpu.memory_space<smem>>
    %10 = arith.index_cast %9 : i32 to index
    %c0_3 = arith.constant 0 : index
    %11 = vector.load %arg1[%10, %c0_3] : memref<64x32xf32, #tpu.memory_space<vmem>>, vector<1x32xf32>
    %c4 = arith.constant 4 : index
    %12 = memref.load %arg0[%c4] : memref<8xi32, #tpu.memory_space<smem>>
    %13 = arith.index_cast %12 : i32 to index
    %c0_4 = arith.constant 0 : index
    %14 = vector.load %arg1[%13, %c0_4] : memref<64x32xf32, #tpu.memory_space<vmem>>, vector<1x32xf32>
    %c5 = arith.constant 5 : index
    %15 = memref.load %arg0[%c5] : memref<8xi32, #tpu.memory_space<smem>>
    %16 = arith.index_cast %15 : i32 to index
    %c0_5 = arith.constant 0 : index
    %17 = vector.load %arg1[%16, %c0_5] : memref<64x32xf32, #tpu.memory_space<vmem>>, vector<1x32xf32>
    %c6 = arith.constant 6 : index
    %18 = memref.load %arg0[%c6] : memref<8xi32, #tpu.memory_space<smem>>
    %19 = arith.index_cast %18 : i32 to index
    %c0_6 = arith.constant 0 : index
    %20 = vector.load %arg1[%19, %c0_6] : memref<64x32xf32, #tpu.memory_space<vmem>>, vector<1x32xf32>
    %c7 = arith.constant 7 : index
    %21 = memref.load %arg0[%c7] : memref<8xi32, #tpu.memory_space<smem>>
    %22 = arith.index_cast %21 : i32 to index
    %c0_7 = arith.constant 0 : index
    %23 = vector.load %arg1[%22, %c0_7] : memref<64x32xf32, #tpu.memory_space<vmem>>, vector<1x32xf32>
    %24 = tpu.concatenate %2, %5, %8, %11, %14, %17, %20, %23 in 0 : vector<1x32xf32>, vector<1x32xf32>, vector<1x32xf32>, vector<1x32xf32>, vector<1x32xf32>, vector<1x32xf32>, vector<1x32xf32>, vector<1x32xf32> -> vector<8x32xf32>
    %c0_8 = arith.constant 0 : index
    %c0_9 = arith.constant 0 : index
    %25 = vector.load %arg3[%c0_8, %c0_9] : memref<32x128xf32, #tpu.memory_space<vmem>>, vector<32x128xf32>
    %c0_10 = arith.constant 0 : index
    %c0_11 = arith.constant 0 : index
    %26 = vector.load %arg5[%c0_10, %c0_11] : memref<2x128xf32, #tpu.memory_space<vmem>>, vector<1x128xf32>
    %c0_12 = arith.constant 0 : index
    %c0_13 = arith.constant 0 : index
    %27 = vector.load %arg2[%c0_12, %c0_13] : memref<32x128xf32, #tpu.memory_space<vmem>>, vector<32x128xf32>
    %cst = arith.constant dense<0.000000e+00> : vector<8x128xf32>
    %28 = tpu.matmul %24, %27, %cst {dimension_numbers = #tpu.dot_dimension_numbers<[1], [0], [0], [1], [0, 0, 1, 1], [], []>} : vector<8x32xf32>, vector<32x128xf32>, vector<8x128xf32> -> vector<8x128xf32>
    %29 = vector.broadcast %26 : vector<1x128xf32> to vector<8x128xf32>
    %30 = arith.addf %28, %29 : vector<8x128xf32>
    %c0_14 = arith.constant 0 : index
    %c0_15 = arith.constant 0 : index
    %31 = vector.load %arg6[%c0_14, %c0_15] : memref<2x32xf32, #tpu.memory_space<vmem>>, vector<1x32xf32>
    %c0_16 = arith.constant 0 : index
    %c0_17 = arith.constant 0 : index
    %32 = vector.load %arg7[%c0_16, %c0_17] : memref<2x32xf32, #tpu.memory_space<vmem>>, vector<1x32xf32>
    %33 = vector.extract_strided_slice %30 {offsets = [0, 0], sizes = [1, 128], strides = [1, 1]} : vector<8x128xf32> to vector<1x128xf32>
    %cst_18 = arith.constant dense<0.000000e+00> : vector<1x128xf32>
    %34 = tpu.matmul %31, %25, %cst_18 {dimension_numbers = #tpu.dot_dimension_numbers<[1], [0], [0], [1], [0, 0, 1, 1], [], []>} : vector<1x32xf32>, vector<32x128xf32>, vector<1x128xf32> -> vector<1x128xf32>
    %35 = arith.addf %33, %34 : vector<1x128xf32>
    %36 = arith.negf %35 : vector<1x128xf32>
    %37 = math.exp %36 : vector<1x128xf32>
    %cst_19 = arith.constant 1.000000e+00 : f32
    %38 = vector.broadcast %cst_19 : f32 to vector<1x128xf32>
    %39 = arith.addf %38, %37 : vector<1x128xf32>
    %40 = arith.divf %38, %39 : vector<1x128xf32>
    %41 = math.tanh %35 : vector<1x128xf32>
    %42 = vector.extract_strided_slice %40 {offsets = [0, 0], sizes = [1, 32], strides = [1, 1]} : vector<1x128xf32> to vector<1x32xf32>
    %43 = vector.extract_strided_slice %40 {offsets = [0, 32], sizes = [1, 32], strides = [1, 1]} : vector<1x128xf32> to vector<1x32xf32>
    %44 = vector.extract_strided_slice %41 {offsets = [0, 64], sizes = [1, 32], strides = [1, 1]} : vector<1x128xf32> to vector<1x32xf32>
    %45 = vector.extract_strided_slice %40 {offsets = [0, 96], sizes = [1, 32], strides = [1, 1]} : vector<1x128xf32> to vector<1x32xf32>
    %46 = arith.mulf %43, %32 : vector<1x32xf32>
    %47 = arith.mulf %42, %44 : vector<1x32xf32>
    %48 = arith.addf %46, %47 : vector<1x32xf32>
    %49 = math.tanh %48 : vector<1x32xf32>
    %50 = arith.mulf %45, %49 : vector<1x32xf32>
    %51 = vector.extract_strided_slice %30 {offsets = [1, 0], sizes = [1, 128], strides = [1, 1]} : vector<8x128xf32> to vector<1x128xf32>
    %cst_20 = arith.constant dense<0.000000e+00> : vector<1x128xf32>
    %52 = tpu.matmul %50, %25, %cst_20 {dimension_numbers = #tpu.dot_dimension_numbers<[1], [0], [0], [1], [0, 0, 1, 1], [], []>} : vector<1x32xf32>, vector<32x128xf32>, vector<1x128xf32> -> vector<1x128xf32>
    %53 = arith.addf %51, %52 : vector<1x128xf32>
    %54 = arith.negf %53 : vector<1x128xf32>
    %55 = math.exp %54 : vector<1x128xf32>
    %cst_21 = arith.constant 1.000000e+00 : f32
    %56 = vector.broadcast %cst_21 : f32 to vector<1x128xf32>
    %57 = arith.addf %56, %55 : vector<1x128xf32>
    %58 = arith.divf %56, %57 : vector<1x128xf32>
    %59 = math.tanh %53 : vector<1x128xf32>
    %60 = vector.extract_strided_slice %58 {offsets = [0, 0], sizes = [1, 32], strides = [1, 1]} : vector<1x128xf32> to vector<1x32xf32>
    %61 = vector.extract_strided_slice %58 {offsets = [0, 32], sizes = [1, 32], strides = [1, 1]} : vector<1x128xf32> to vector<1x32xf32>
    %62 = vector.extract_strided_slice %59 {offsets = [0, 64], sizes = [1, 32], strides = [1, 1]} : vector<1x128xf32> to vector<1x32xf32>
    %63 = vector.extract_strided_slice %58 {offsets = [0, 96], sizes = [1, 32], strides = [1, 1]} : vector<1x128xf32> to vector<1x32xf32>
    %64 = arith.mulf %61, %48 : vector<1x32xf32>
    %65 = arith.mulf %60, %62 : vector<1x32xf32>
    %66 = arith.addf %64, %65 : vector<1x32xf32>
    %67 = math.tanh %66 : vector<1x32xf32>
    %68 = arith.mulf %63, %67 : vector<1x32xf32>
    %69 = vector.extract_strided_slice %30 {offsets = [2, 0], sizes = [1, 128], strides = [1, 1]} : vector<8x128xf32> to vector<1x128xf32>
    %cst_22 = arith.constant dense<0.000000e+00> : vector<1x128xf32>
    %70 = tpu.matmul %68, %25, %cst_22 {dimension_numbers = #tpu.dot_dimension_numbers<[1], [0], [0], [1], [0, 0, 1, 1], [], []>} : vector<1x32xf32>, vector<32x128xf32>, vector<1x128xf32> -> vector<1x128xf32>
    %71 = arith.addf %69, %70 : vector<1x128xf32>
    %72 = arith.negf %71 : vector<1x128xf32>
    %73 = math.exp %72 : vector<1x128xf32>
    %cst_23 = arith.constant 1.000000e+00 : f32
    %74 = vector.broadcast %cst_23 : f32 to vector<1x128xf32>
    %75 = arith.addf %74, %73 : vector<1x128xf32>
    %76 = arith.divf %74, %75 : vector<1x128xf32>
    %77 = math.tanh %71 : vector<1x128xf32>
    %78 = vector.extract_strided_slice %76 {offsets = [0, 0], sizes = [1, 32], strides = [1, 1]} : vector<1x128xf32> to vector<1x32xf32>
    %79 = vector.extract_strided_slice %76 {offsets = [0, 32], sizes = [1, 32], strides = [1, 1]} : vector<1x128xf32> to vector<1x32xf32>
    %80 = vector.extract_strided_slice %77 {offsets = [0, 64], sizes = [1, 32], strides = [1, 1]} : vector<1x128xf32> to vector<1x32xf32>
    %81 = vector.extract_strided_slice %76 {offsets = [0, 96], sizes = [1, 32], strides = [1, 1]} : vector<1x128xf32> to vector<1x32xf32>
    %82 = arith.mulf %79, %66 : vector<1x32xf32>
    %83 = arith.mulf %78, %80 : vector<1x32xf32>
    %84 = arith.addf %82, %83 : vector<1x32xf32>
    %85 = math.tanh %84 : vector<1x32xf32>
    %86 = arith.mulf %81, %85 : vector<1x32xf32>
    %87 = vector.extract_strided_slice %30 {offsets = [3, 0], sizes = [1, 128], strides = [1, 1]} : vector<8x128xf32> to vector<1x128xf32>
    %cst_24 = arith.constant dense<0.000000e+00> : vector<1x128xf32>
    %88 = tpu.matmul %86, %25, %cst_24 {dimension_numbers = #tpu.dot_dimension_numbers<[1], [0], [0], [1], [0, 0, 1, 1], [], []>} : vector<1x32xf32>, vector<32x128xf32>, vector<1x128xf32> -> vector<1x128xf32>
    %89 = arith.addf %87, %88 : vector<1x128xf32>
    %90 = arith.negf %89 : vector<1x128xf32>
    %91 = math.exp %90 : vector<1x128xf32>
    %cst_25 = arith.constant 1.000000e+00 : f32
    %92 = vector.broadcast %cst_25 : f32 to vector<1x128xf32>
    %93 = arith.addf %92, %91 : vector<1x128xf32>
    %94 = arith.divf %92, %93 : vector<1x128xf32>
    %95 = math.tanh %89 : vector<1x128xf32>
    %96 = vector.extract_strided_slice %94 {offsets = [0, 0], sizes = [1, 32], strides = [1, 1]} : vector<1x128xf32> to vector<1x32xf32>
    %97 = vector.extract_strided_slice %94 {offsets = [0, 32], sizes = [1, 32], strides = [1, 1]} : vector<1x128xf32> to vector<1x32xf32>
    %98 = vector.extract_strided_slice %95 {offsets = [0, 64], sizes = [1, 32], strides = [1, 1]} : vector<1x128xf32> to vector<1x32xf32>
    %99 = vector.extract_strided_slice %94 {offsets = [0, 96], sizes = [1, 32], strides = [1, 1]} : vector<1x128xf32> to vector<1x32xf32>
    %100 = arith.mulf %97, %84 : vector<1x32xf32>
    %101 = arith.mulf %96, %98 : vector<1x32xf32>
    %102 = arith.addf %100, %101 : vector<1x32xf32>
    %103 = math.tanh %102 : vector<1x32xf32>
    %104 = arith.mulf %99, %103 : vector<1x32xf32>
    %105 = vector.extract_strided_slice %30 {offsets = [4, 0], sizes = [1, 128], strides = [1, 1]} : vector<8x128xf32> to vector<1x128xf32>
    %cst_26 = arith.constant dense<0.000000e+00> : vector<1x128xf32>
    %106 = tpu.matmul %104, %25, %cst_26 {dimension_numbers = #tpu.dot_dimension_numbers<[1], [0], [0], [1], [0, 0, 1, 1], [], []>} : vector<1x32xf32>, vector<32x128xf32>, vector<1x128xf32> -> vector<1x128xf32>
    %107 = arith.addf %105, %106 : vector<1x128xf32>
    %108 = arith.negf %107 : vector<1x128xf32>
    %109 = math.exp %108 : vector<1x128xf32>
    %cst_27 = arith.constant 1.000000e+00 : f32
    %110 = vector.broadcast %cst_27 : f32 to vector<1x128xf32>
    %111 = arith.addf %110, %109 : vector<1x128xf32>
    %112 = arith.divf %110, %111 : vector<1x128xf32>
    %113 = math.tanh %107 : vector<1x128xf32>
    %114 = vector.extract_strided_slice %112 {offsets = [0, 0], sizes = [1, 32], strides = [1, 1]} : vector<1x128xf32> to vector<1x32xf32>
    %115 = vector.extract_strided_slice %112 {offsets = [0, 32], sizes = [1, 32], strides = [1, 1]} : vector<1x128xf32> to vector<1x32xf32>
    %116 = vector.extract_strided_slice %113 {offsets = [0, 64], sizes = [1, 32], strides = [1, 1]} : vector<1x128xf32> to vector<1x32xf32>
    %117 = vector.extract_strided_slice %112 {offsets = [0, 96], sizes = [1, 32], strides = [1, 1]} : vector<1x128xf32> to vector<1x32xf32>
    %118 = arith.mulf %115, %102 : vector<1x32xf32>
    %119 = arith.mulf %114, %116 : vector<1x32xf32>
    %120 = arith.addf %118, %119 : vector<1x32xf32>
    %121 = math.tanh %120 : vector<1x32xf32>
    %122 = arith.mulf %117, %121 : vector<1x32xf32>
    %123 = vector.extract_strided_slice %30 {offsets = [5, 0], sizes = [1, 128], strides = [1, 1]} : vector<8x128xf32> to vector<1x128xf32>
    %cst_28 = arith.constant dense<0.000000e+00> : vector<1x128xf32>
    %124 = tpu.matmul %122, %25, %cst_28 {dimension_numbers = #tpu.dot_dimension_numbers<[1], [0], [0], [1], [0, 0, 1, 1], [], []>} : vector<1x32xf32>, vector<32x128xf32>, vector<1x128xf32> -> vector<1x128xf32>
    %125 = arith.addf %123, %124 : vector<1x128xf32>
    %126 = arith.negf %125 : vector<1x128xf32>
    %127 = math.exp %126 : vector<1x128xf32>
    %cst_29 = arith.constant 1.000000e+00 : f32
    %128 = vector.broadcast %cst_29 : f32 to vector<1x128xf32>
    %129 = arith.addf %128, %127 : vector<1x128xf32>
    %130 = arith.divf %128, %129 : vector<1x128xf32>
    %131 = math.tanh %125 : vector<1x128xf32>
    %132 = vector.extract_strided_slice %130 {offsets = [0, 0], sizes = [1, 32], strides = [1, 1]} : vector<1x128xf32> to vector<1x32xf32>
    %133 = vector.extract_strided_slice %130 {offsets = [0, 32], sizes = [1, 32], strides = [1, 1]} : vector<1x128xf32> to vector<1x32xf32>
    %134 = vector.extract_strided_slice %131 {offsets = [0, 64], sizes = [1, 32], strides = [1, 1]} : vector<1x128xf32> to vector<1x32xf32>
    %135 = vector.extract_strided_slice %130 {offsets = [0, 96], sizes = [1, 32], strides = [1, 1]} : vector<1x128xf32> to vector<1x32xf32>
    %136 = arith.mulf %133, %120 : vector<1x32xf32>
    %137 = arith.mulf %132, %134 : vector<1x32xf32>
    %138 = arith.addf %136, %137 : vector<1x32xf32>
    %139 = math.tanh %138 : vector<1x32xf32>
    %140 = arith.mulf %135, %139 : vector<1x32xf32>
    %141 = vector.extract_strided_slice %30 {offsets = [6, 0], sizes = [1, 128], strides = [1, 1]} : vector<8x128xf32> to vector<1x128xf32>
    %cst_30 = arith.constant dense<0.000000e+00> : vector<1x128xf32>
    %142 = tpu.matmul %140, %25, %cst_30 {dimension_numbers = #tpu.dot_dimension_numbers<[1], [0], [0], [1], [0, 0, 1, 1], [], []>} : vector<1x32xf32>, vector<32x128xf32>, vector<1x128xf32> -> vector<1x128xf32>
    %143 = arith.addf %141, %142 : vector<1x128xf32>
    %144 = arith.negf %143 : vector<1x128xf32>
    %145 = math.exp %144 : vector<1x128xf32>
    %cst_31 = arith.constant 1.000000e+00 : f32
    %146 = vector.broadcast %cst_31 : f32 to vector<1x128xf32>
    %147 = arith.addf %146, %145 : vector<1x128xf32>
    %148 = arith.divf %146, %147 : vector<1x128xf32>
    %149 = math.tanh %143 : vector<1x128xf32>
    %150 = vector.extract_strided_slice %148 {offsets = [0, 0], sizes = [1, 32], strides = [1, 1]} : vector<1x128xf32> to vector<1x32xf32>
    %151 = vector.extract_strided_slice %148 {offsets = [0, 32], sizes = [1, 32], strides = [1, 1]} : vector<1x128xf32> to vector<1x32xf32>
    %152 = vector.extract_strided_slice %149 {offsets = [0, 64], sizes = [1, 32], strides = [1, 1]} : vector<1x128xf32> to vector<1x32xf32>
    %153 = vector.extract_strided_slice %148 {offsets = [0, 96], sizes = [1, 32], strides = [1, 1]} : vector<1x128xf32> to vector<1x32xf32>
    %154 = arith.mulf %151, %138 : vector<1x32xf32>
    %155 = arith.mulf %150, %152 : vector<1x32xf32>
    %156 = arith.addf %154, %155 : vector<1x32xf32>
    %157 = math.tanh %156 : vector<1x32xf32>
    %158 = arith.mulf %153, %157 : vector<1x32xf32>
    %159 = vector.extract_strided_slice %30 {offsets = [7, 0], sizes = [1, 128], strides = [1, 1]} : vector<8x128xf32> to vector<1x128xf32>
    %cst_32 = arith.constant dense<0.000000e+00> : vector<1x128xf32>
    %160 = tpu.matmul %158, %25, %cst_32 {dimension_numbers = #tpu.dot_dimension_numbers<[1], [0], [0], [1], [0, 0, 1, 1], [], []>} : vector<1x32xf32>, vector<32x128xf32>, vector<1x128xf32> -> vector<1x128xf32>
    %161 = arith.addf %159, %160 : vector<1x128xf32>
    %162 = arith.negf %161 : vector<1x128xf32>
    %163 = math.exp %162 : vector<1x128xf32>
    %cst_33 = arith.constant 1.000000e+00 : f32
    %164 = vector.broadcast %cst_33 : f32 to vector<1x128xf32>
    %165 = arith.addf %164, %163 : vector<1x128xf32>
    %166 = arith.divf %164, %165 : vector<1x128xf32>
    %167 = math.tanh %161 : vector<1x128xf32>
    %168 = vector.extract_strided_slice %166 {offsets = [0, 0], sizes = [1, 32], strides = [1, 1]} : vector<1x128xf32> to vector<1x32xf32>
    %169 = vector.extract_strided_slice %166 {offsets = [0, 32], sizes = [1, 32], strides = [1, 1]} : vector<1x128xf32> to vector<1x32xf32>
    %170 = vector.extract_strided_slice %167 {offsets = [0, 64], sizes = [1, 32], strides = [1, 1]} : vector<1x128xf32> to vector<1x32xf32>
    %171 = vector.extract_strided_slice %166 {offsets = [0, 96], sizes = [1, 32], strides = [1, 1]} : vector<1x128xf32> to vector<1x32xf32>
    %172 = arith.mulf %169, %156 : vector<1x32xf32>
    %173 = arith.mulf %168, %170 : vector<1x32xf32>
    %174 = arith.addf %172, %173 : vector<1x32xf32>
    %175 = math.tanh %174 : vector<1x32xf32>
    %176 = arith.mulf %171, %175 : vector<1x32xf32>
    %c0_34 = arith.constant 0 : index
    %c0_35 = arith.constant 0 : index
    %177 = vector.load %arg11[%c0_34, %c0_35] : memref<2x32xf32, #tpu.memory_space<vmem>>, vector<1x32xf32>
    tpu.vector_store %arg11[%c0_34, %c0_35], %176 {strides = array<i32>} : memref<2x32xf32, #tpu.memory_space<vmem>>, vector<1x32xf32>,
    %c0_36 = arith.constant 0 : index
    %c0_37 = arith.constant 0 : index
    %178 = vector.load %arg12[%c0_36, %c0_37] : memref<2x32xf32, #tpu.memory_space<vmem>>, vector<1x32xf32>
    tpu.vector_store %arg12[%c0_36, %c0_37], %174 {strides = array<i32>} : memref<2x32xf32, #tpu.memory_space<vmem>>, vector<1x32xf32>,
    %c0_38 = arith.constant 0 : index
    %c0_39 = arith.constant 0 : index
    %c0_40 = arith.constant 0 : index
    %179 = vector.load %arg4[%c0_38, %c0_39, %c0_40] : memref<1x64x128xf32, #tpu.memory_space<vmem>>, vector<1x64x128xf32>
    %180 = vector.shape_cast %179 : vector<1x64x128xf32> to vector<64x128xf32>
    %c1_41 = arith.constant 1 : index
    %c0_42 = arith.constant 0 : index
    %181 = vector.load %arg5[%c1_41, %c0_42] : memref<2x128xf32, #tpu.memory_space<vmem>>, vector<1x128xf32>
    %c1_43 = arith.constant 1 : index
    %c0_44 = arith.constant 0 : index
    %182 = vector.load %arg6[%c1_43, %c0_44] : memref<2x32xf32, #tpu.memory_space<vmem>>, vector<1x32xf32>
    %c1_45 = arith.constant 1 : index
    %c0_46 = arith.constant 0 : index
    %183 = vector.load %arg7[%c1_45, %c0_46] : memref<2x32xf32, #tpu.memory_space<vmem>>, vector<1x32xf32>
    %184 = tpu.concatenate %50, %182 in 1 : vector<1x32xf32>, vector<1x32xf32> -> vector<1x64xf32>
    %cst_47 = arith.constant dense<0.000000e+00> : vector<1x128xf32>
    %185 = tpu.matmul %184, %180, %cst_47 {dimension_numbers = #tpu.dot_dimension_numbers<[1], [0], [0], [1], [0, 0, 1, 1], [], []>} : vector<1x64xf32>, vector<64x128xf32>, vector<1x128xf32> -> vector<1x128xf32>
    %186 = arith.addf %185, %181 : vector<1x128xf32>
    %187 = arith.negf %186 : vector<1x128xf32>
    %188 = math.exp %187 : vector<1x128xf32>
    %cst_48 = arith.constant 1.000000e+00 : f32
    %189 = vector.broadcast %cst_48 : f32 to vector<1x128xf32>
    %190 = arith.addf %189, %188 : vector<1x128xf32>
    %191 = arith.divf %189, %190 : vector<1x128xf32>
    %192 = math.tanh %186 : vector<1x128xf32>
    %193 = vector.extract_strided_slice %191 {offsets = [0, 0], sizes = [1, 32], strides = [1, 1]} : vector<1x128xf32> to vector<1x32xf32>
    %194 = vector.extract_strided_slice %191 {offsets = [0, 32], sizes = [1, 32], strides = [1, 1]} : vector<1x128xf32> to vector<1x32xf32>
    %195 = vector.extract_strided_slice %192 {offsets = [0, 64], sizes = [1, 32], strides = [1, 1]} : vector<1x128xf32> to vector<1x32xf32>
    %196 = vector.extract_strided_slice %191 {offsets = [0, 96], sizes = [1, 32], strides = [1, 1]} : vector<1x128xf32> to vector<1x32xf32>
    %197 = arith.mulf %194, %183 : vector<1x32xf32>
    %198 = arith.mulf %193, %195 : vector<1x32xf32>
    %199 = arith.addf %197, %198 : vector<1x32xf32>
    %200 = math.tanh %199 : vector<1x32xf32>
    %201 = arith.mulf %196, %200 : vector<1x32xf32>
    %202 = tpu.concatenate %68, %201 in 1 : vector<1x32xf32>, vector<1x32xf32> -> vector<1x64xf32>
    %cst_49 = arith.constant dense<0.000000e+00> : vector<1x128xf32>
    %203 = tpu.matmul %202, %180, %cst_49 {dimension_numbers = #tpu.dot_dimension_numbers<[1], [0], [0], [1], [0, 0, 1, 1], [], []>} : vector<1x64xf32>, vector<64x128xf32>, vector<1x128xf32> -> vector<1x128xf32>
    %204 = arith.addf %203, %181 : vector<1x128xf32>
    %205 = arith.negf %204 : vector<1x128xf32>
    %206 = math.exp %205 : vector<1x128xf32>
    %cst_50 = arith.constant 1.000000e+00 : f32
    %207 = vector.broadcast %cst_50 : f32 to vector<1x128xf32>
    %208 = arith.addf %207, %206 : vector<1x128xf32>
    %209 = arith.divf %207, %208 : vector<1x128xf32>
    %210 = math.tanh %204 : vector<1x128xf32>
    %211 = vector.extract_strided_slice %209 {offsets = [0, 0], sizes = [1, 32], strides = [1, 1]} : vector<1x128xf32> to vector<1x32xf32>
    %212 = vector.extract_strided_slice %209 {offsets = [0, 32], sizes = [1, 32], strides = [1, 1]} : vector<1x128xf32> to vector<1x32xf32>
    %213 = vector.extract_strided_slice %210 {offsets = [0, 64], sizes = [1, 32], strides = [1, 1]} : vector<1x128xf32> to vector<1x32xf32>
    %214 = vector.extract_strided_slice %209 {offsets = [0, 96], sizes = [1, 32], strides = [1, 1]} : vector<1x128xf32> to vector<1x32xf32>
    %215 = arith.mulf %212, %199 : vector<1x32xf32>
    %216 = arith.mulf %211, %213 : vector<1x32xf32>
    %217 = arith.addf %215, %216 : vector<1x32xf32>
    %218 = math.tanh %217 : vector<1x32xf32>
    %219 = arith.mulf %214, %218 : vector<1x32xf32>
    %220 = tpu.concatenate %86, %219 in 1 : vector<1x32xf32>, vector<1x32xf32> -> vector<1x64xf32>
    %cst_51 = arith.constant dense<0.000000e+00> : vector<1x128xf32>
    %221 = tpu.matmul %220, %180, %cst_51 {dimension_numbers = #tpu.dot_dimension_numbers<[1], [0], [0], [1], [0, 0, 1, 1], [], []>} : vector<1x64xf32>, vector<64x128xf32>, vector<1x128xf32> -> vector<1x128xf32>
    %222 = arith.addf %221, %181 : vector<1x128xf32>
    %223 = arith.negf %222 : vector<1x128xf32>
    %224 = math.exp %223 : vector<1x128xf32>
    %cst_52 = arith.constant 1.000000e+00 : f32
    %225 = vector.broadcast %cst_52 : f32 to vector<1x128xf32>
    %226 = arith.addf %225, %224 : vector<1x128xf32>
    %227 = arith.divf %225, %226 : vector<1x128xf32>
    %228 = math.tanh %222 : vector<1x128xf32>
    %229 = vector.extract_strided_slice %227 {offsets = [0, 0], sizes = [1, 32], strides = [1, 1]} : vector<1x128xf32> to vector<1x32xf32>
    %230 = vector.extract_strided_slice %227 {offsets = [0, 32], sizes = [1, 32], strides = [1, 1]} : vector<1x128xf32> to vector<1x32xf32>
    %231 = vector.extract_strided_slice %228 {offsets = [0, 64], sizes = [1, 32], strides = [1, 1]} : vector<1x128xf32> to vector<1x32xf32>
    %232 = vector.extract_strided_slice %227 {offsets = [0, 96], sizes = [1, 32], strides = [1, 1]} : vector<1x128xf32> to vector<1x32xf32>
    %233 = arith.mulf %230, %217 : vector<1x32xf32>
    %234 = arith.mulf %229, %231 : vector<1x32xf32>
    %235 = arith.addf %233, %234 : vector<1x32xf32>
    %236 = math.tanh %235 : vector<1x32xf32>
    %237 = arith.mulf %232, %236 : vector<1x32xf32>
    %238 = tpu.concatenate %104, %237 in 1 : vector<1x32xf32>, vector<1x32xf32> -> vector<1x64xf32>
    %cst_53 = arith.constant dense<0.000000e+00> : vector<1x128xf32>
    %239 = tpu.matmul %238, %180, %cst_53 {dimension_numbers = #tpu.dot_dimension_numbers<[1], [0], [0], [1], [0, 0, 1, 1], [], []>} : vector<1x64xf32>, vector<64x128xf32>, vector<1x128xf32> -> vector<1x128xf32>
    %240 = arith.addf %239, %181 : vector<1x128xf32>
    %241 = arith.negf %240 : vector<1x128xf32>
    %242 = math.exp %241 : vector<1x128xf32>
    %cst_54 = arith.constant 1.000000e+00 : f32
    %243 = vector.broadcast %cst_54 : f32 to vector<1x128xf32>
    %244 = arith.addf %243, %242 : vector<1x128xf32>
    %245 = arith.divf %243, %244 : vector<1x128xf32>
    %246 = math.tanh %240 : vector<1x128xf32>
    %247 = vector.extract_strided_slice %245 {offsets = [0, 0], sizes = [1, 32], strides = [1, 1]} : vector<1x128xf32> to vector<1x32xf32>
    %248 = vector.extract_strided_slice %245 {offsets = [0, 32], sizes = [1, 32], strides = [1, 1]} : vector<1x128xf32> to vector<1x32xf32>
    %249 = vector.extract_strided_slice %246 {offsets = [0, 64], sizes = [1, 32], strides = [1, 1]} : vector<1x128xf32> to vector<1x32xf32>
    %250 = vector.extract_strided_slice %245 {offsets = [0, 96], sizes = [1, 32], strides = [1, 1]} : vector<1x128xf32> to vector<1x32xf32>
    %251 = arith.mulf %248, %235 : vector<1x32xf32>
    %252 = arith.mulf %247, %249 : vector<1x32xf32>
    %253 = arith.addf %251, %252 : vector<1x32xf32>
    %254 = math.tanh %253 : vector<1x32xf32>
    %255 = arith.mulf %250, %254 : vector<1x32xf32>
    %256 = tpu.concatenate %122, %255 in 1 : vector<1x32xf32>, vector<1x32xf32> -> vector<1x64xf32>
    %cst_55 = arith.constant dense<0.000000e+00> : vector<1x128xf32>
    %257 = tpu.matmul %256, %180, %cst_55 {dimension_numbers = #tpu.dot_dimension_numbers<[1], [0], [0], [1], [0, 0, 1, 1], [], []>} : vector<1x64xf32>, vector<64x128xf32>, vector<1x128xf32> -> vector<1x128xf32>
    %258 = arith.addf %257, %181 : vector<1x128xf32>
    %259 = arith.negf %258 : vector<1x128xf32>
    %260 = math.exp %259 : vector<1x128xf32>
    %cst_56 = arith.constant 1.000000e+00 : f32
    %261 = vector.broadcast %cst_56 : f32 to vector<1x128xf32>
    %262 = arith.addf %261, %260 : vector<1x128xf32>
    %263 = arith.divf %261, %262 : vector<1x128xf32>
    %264 = math.tanh %258 : vector<1x128xf32>
    %265 = vector.extract_strided_slice %263 {offsets = [0, 0], sizes = [1, 32], strides = [1, 1]} : vector<1x128xf32> to vector<1x32xf32>
    %266 = vector.extract_strided_slice %263 {offsets = [0, 32], sizes = [1, 32], strides = [1, 1]} : vector<1x128xf32> to vector<1x32xf32>
    %267 = vector.extract_strided_slice %264 {offsets = [0, 64], sizes = [1, 32], strides = [1, 1]} : vector<1x128xf32> to vector<1x32xf32>
    %268 = vector.extract_strided_slice %263 {offsets = [0, 96], sizes = [1, 32], strides = [1, 1]} : vector<1x128xf32> to vector<1x32xf32>
    %269 = arith.mulf %266, %253 : vector<1x32xf32>
    %270 = arith.mulf %265, %267 : vector<1x32xf32>
    %271 = arith.addf %269, %270 : vector<1x32xf32>
    %272 = math.tanh %271 : vector<1x32xf32>
    %273 = arith.mulf %268, %272 : vector<1x32xf32>
    %274 = tpu.concatenate %140, %273 in 1 : vector<1x32xf32>, vector<1x32xf32> -> vector<1x64xf32>
    %cst_57 = arith.constant dense<0.000000e+00> : vector<1x128xf32>
    %275 = tpu.matmul %274, %180, %cst_57 {dimension_numbers = #tpu.dot_dimension_numbers<[1], [0], [0], [1], [0, 0, 1, 1], [], []>} : vector<1x64xf32>, vector<64x128xf32>, vector<1x128xf32> -> vector<1x128xf32>
    %276 = arith.addf %275, %181 : vector<1x128xf32>
    %277 = arith.negf %276 : vector<1x128xf32>
    %278 = math.exp %277 : vector<1x128xf32>
    %cst_58 = arith.constant 1.000000e+00 : f32
    %279 = vector.broadcast %cst_58 : f32 to vector<1x128xf32>
    %280 = arith.addf %279, %278 : vector<1x128xf32>
    %281 = arith.divf %279, %280 : vector<1x128xf32>
    %282 = math.tanh %276 : vector<1x128xf32>
    %283 = vector.extract_strided_slice %281 {offsets = [0, 0], sizes = [1, 32], strides = [1, 1]} : vector<1x128xf32> to vector<1x32xf32>
    %284 = vector.extract_strided_slice %281 {offsets = [0, 32], sizes = [1, 32], strides = [1, 1]} : vector<1x128xf32> to vector<1x32xf32>
    %285 = vector.extract_strided_slice %282 {offsets = [0, 64], sizes = [1, 32], strides = [1, 1]} : vector<1x128xf32> to vector<1x32xf32>
    %286 = vector.extract_strided_slice %281 {offsets = [0, 96], sizes = [1, 32], strides = [1, 1]} : vector<1x128xf32> to vector<1x32xf32>
    %287 = arith.mulf %284, %271 : vector<1x32xf32>
    %288 = arith.mulf %283, %285 : vector<1x32xf32>
    %289 = arith.addf %287, %288 : vector<1x32xf32>
    %290 = math.tanh %289 : vector<1x32xf32>
    %291 = arith.mulf %286, %290 : vector<1x32xf32>
    %292 = tpu.concatenate %158, %291 in 1 : vector<1x32xf32>, vector<1x32xf32> -> vector<1x64xf32>
    %cst_59 = arith.constant dense<0.000000e+00> : vector<1x128xf32>
    %293 = tpu.matmul %292, %180, %cst_59 {dimension_numbers = #tpu.dot_dimension_numbers<[1], [0], [0], [1], [0, 0, 1, 1], [], []>} : vector<1x64xf32>, vector<64x128xf32>, vector<1x128xf32> -> vector<1x128xf32>
    %294 = arith.addf %293, %181 : vector<1x128xf32>
    %295 = arith.negf %294 : vector<1x128xf32>
    %296 = math.exp %295 : vector<1x128xf32>
    %cst_60 = arith.constant 1.000000e+00 : f32
    %297 = vector.broadcast %cst_60 : f32 to vector<1x128xf32>
    %298 = arith.addf %297, %296 : vector<1x128xf32>
    %299 = arith.divf %297, %298 : vector<1x128xf32>
    %300 = math.tanh %294 : vector<1x128xf32>
    %301 = vector.extract_strided_slice %299 {offsets = [0, 0], sizes = [1, 32], strides = [1, 1]} : vector<1x128xf32> to vector<1x32xf32>
    %302 = vector.extract_strided_slice %299 {offsets = [0, 32], sizes = [1, 32], strides = [1, 1]} : vector<1x128xf32> to vector<1x32xf32>
    %303 = vector.extract_strided_slice %300 {offsets = [0, 64], sizes = [1, 32], strides = [1, 1]} : vector<1x128xf32> to vector<1x32xf32>
    %304 = vector.extract_strided_slice %299 {offsets = [0, 96], sizes = [1, 32], strides = [1, 1]} : vector<1x128xf32> to vector<1x32xf32>
    %305 = arith.mulf %302, %289 : vector<1x32xf32>
    %306 = arith.mulf %301, %303 : vector<1x32xf32>
    %307 = arith.addf %305, %306 : vector<1x32xf32>
    %308 = math.tanh %307 : vector<1x32xf32>
    %309 = arith.mulf %304, %308 : vector<1x32xf32>
    %310 = tpu.concatenate %176, %309 in 1 : vector<1x32xf32>, vector<1x32xf32> -> vector<1x64xf32>
    %cst_61 = arith.constant dense<0.000000e+00> : vector<1x128xf32>
    %311 = tpu.matmul %310, %180, %cst_61 {dimension_numbers = #tpu.dot_dimension_numbers<[1], [0], [0], [1], [0, 0, 1, 1], [], []>} : vector<1x64xf32>, vector<64x128xf32>, vector<1x128xf32> -> vector<1x128xf32>
    %312 = arith.addf %311, %181 : vector<1x128xf32>
    %313 = arith.negf %312 : vector<1x128xf32>
    %314 = math.exp %313 : vector<1x128xf32>
    %cst_62 = arith.constant 1.000000e+00 : f32
    %315 = vector.broadcast %cst_62 : f32 to vector<1x128xf32>
    %316 = arith.addf %315, %314 : vector<1x128xf32>
    %317 = arith.divf %315, %316 : vector<1x128xf32>
    %318 = math.tanh %312 : vector<1x128xf32>
    %319 = vector.extract_strided_slice %317 {offsets = [0, 0], sizes = [1, 32], strides = [1, 1]} : vector<1x128xf32> to vector<1x32xf32>
    %320 = vector.extract_strided_slice %317 {offsets = [0, 32], sizes = [1, 32], strides = [1, 1]} : vector<1x128xf32> to vector<1x32xf32>
    %321 = vector.extract_strided_slice %318 {offsets = [0, 64], sizes = [1, 32], strides = [1, 1]} : vector<1x128xf32> to vector<1x32xf32>
    %322 = vector.extract_strided_slice %317 {offsets = [0, 96], sizes = [1, 32], strides = [1, 1]} : vector<1x128xf32> to vector<1x32xf32>
    %323 = arith.mulf %320, %307 : vector<1x32xf32>
    %324 = arith.mulf %319, %321 : vector<1x32xf32>
    %325 = arith.addf %323, %324 : vector<1x32xf32>
    %326 = math.tanh %325 : vector<1x32xf32>
    %327 = arith.mulf %322, %326 : vector<1x32xf32>
    %c1_63 = arith.constant 1 : index
    %c0_64 = arith.constant 0 : index
    %328 = vector.load %arg11[%c1_63, %c0_64] : memref<2x32xf32, #tpu.memory_space<vmem>>, vector<1x32xf32>
    tpu.vector_store %arg11[%c1_63, %c0_64], %327 {strides = array<i32>} : memref<2x32xf32, #tpu.memory_space<vmem>>, vector<1x32xf32>,
    %c1_65 = arith.constant 1 : index
    %c0_66 = arith.constant 0 : index
    %329 = vector.load %arg12[%c1_65, %c0_66] : memref<2x32xf32, #tpu.memory_space<vmem>>, vector<1x32xf32>
    tpu.vector_store %arg12[%c1_65, %c0_66], %325 {strides = array<i32>} : memref<2x32xf32, #tpu.memory_space<vmem>>, vector<1x32xf32>,
    %330 = tpu.concatenate %201, %219, %237, %255, %273, %291, %309, %327 in 0 : vector<1x32xf32>, vector<1x32xf32>, vector<1x32xf32>, vector<1x32xf32>, vector<1x32xf32>, vector<1x32xf32>, vector<1x32xf32>, vector<1x32xf32> -> vector<8x32xf32>
    %c0_67 = arith.constant 0 : index
    %c0_68 = arith.constant 0 : index
    %331 = vector.load %arg8[%c0_67, %c0_68] : memref<32x64xf32, #tpu.memory_space<vmem>>, vector<32x64xf32>
    %cst_69 = arith.constant dense<0.000000e+00> : vector<8x64xf32>
    %332 = tpu.matmul %330, %331, %cst_69 {dimension_numbers = #tpu.dot_dimension_numbers<[1], [0], [0], [1], [0, 0, 1, 1], [], []>} : vector<8x32xf32>, vector<32x64xf32>, vector<8x64xf32> -> vector<8x64xf32>
    %c0_70 = arith.constant 0 : index
    %c0_71 = arith.constant 0 : index
    %333 = vector.load %arg9[%c0_70, %c0_71] : memref<1x64xf32, #tpu.memory_space<vmem>>, vector<1x64xf32>
    %334 = vector.broadcast %333 : vector<1x64xf32> to vector<8x64xf32>
    %335 = arith.addf %332, %334 : vector<8x64xf32>
    %c0_72 = arith.constant 0 : index
    %c0_73 = arith.constant 0 : index
    %336 = vector.load %arg10[%c0_72, %c0_73] : memref<8x64xf32, #tpu.memory_space<vmem>>, vector<8x64xf32>
    tpu.vector_store %arg10[%c0_72, %c0_73], %335 {strides = array<i32>} : memref<8x64xf32, #tpu.memory_space<vmem>>, vector<8x64xf32>,
    return
  }
}

</mosaic_0001>

<bundles_post_ra>
// kernel: rnnlm_forward.1
= control target key start
LH: loop header
LB: loop body
LE: loop exit
PB: predicated region body
PF: predicated region fallthrough
CT: control target
= control target key end

     0   :  { %18 = vsyncpa [#allocation5], 0  ;;  %s3594_s0 = inlined_call_operand.hbm [shape: s32[8], index: 0, kind: input, shape index: {}]   ;;  %s3595_s1 = inlined_call_operand.vmem [shape: f32[64,32], index: 1, kind: input, shape index: {}]   ;;  %s3596_s2 = inlined_call_operand.vmem [shape: f32[32,128], index: 2, kind: input, shape index: {}]   ;;  %s3597_s3 = inlined_call_operand.hbm [shape: f32[32,128], index: 3, kind: input, shape index: {}]   ;;  %s3598_s4 = inlined_call_operand.vmem [shape: f32[1,64,128], index: 4, kind: input, shape index: {}]   ;;  %s3599_s5 = inlined_call_operand.vmem [shape: f32[2,128], index: 5, kind: input, shape index: {}]   ;;  %s3600_s6 = inlined_call_operand.hbm [shape: f32[2,32], index: 6, kind: input, shape index: {}]   ;;  %s3601_s7 = inlined_call_operand.hbm [shape: f32[2,32], index: 7, kind: input, shape index: {}]   ;;  %s3602_s8 = inlined_call_operand.vmem [shape: f32[32,64], index: 8, kind: input, shape index: {}]   ;;  %s3603_s9 = inlined_call_operand.vmem [shape: f32[1,64], index: 9, kind: input, shape index: {}]   ;;  %s3604_s10 = inlined_call_operand.hbm [shape: f32[8,64], index: 10, kind: output, shape index: {0}]   ;;  %s3605_s11 = inlined_call_operand.hbm [shape: f32[2,32], index: 11, kind: output, shape index: {1}]   ;;  %s3606_s12 = inlined_call_operand.hbm [shape: f32[2,32], index: 12, kind: output, shape index: {2}]  }
   0x1   :  { %19 = vsyncpa [#allocation3], 0 }
   0x2   :  { %20 = vsyncpa [#allocation8], 0 }
   0x3   :  { %21 = vsyncpa [#allocation4], 0 }
   0x4   :  { %22 = vsyncpa [#allocation12], 0  ;;  %s3011_s21 = smov [#allocation7]   ;;  %s3012_s23 = smov [#allocation6]  }
   0x5   :  { %s57_s22 = sshll.u32 %s3011_s21, 4  ;;  %s40_s24 = sshll.u32 %s3012_s23, 4  ;;  %s58_s22 = int_to_ptr.vmem [resolvable:$true] %s57_s22  ;;  %s41_s24 = int_to_ptr.vmem [resolvable:$true] %s40_s24 }
   0x6   :  { %s2859_s27 = scalar_lea.hbm %s3600_s6, 32 }
   0x7   :  { %p2860_p0 = scmp.ne.s32.totalorder %s3600_s6, %s2859_s27  ;;  %p2863_p1 = scmp.lt.u32.totalorder %s2859_s27, %s3600_s6 }
   0x9   :  { %p2865_p2 = pnand %p2863_p1, %p2860_p0 }
   0xb   :  { %2868 = shalt.err (!%p2865_p2)
}
   0xc   :  { %s2869_s14 = scalar_lea.vmem %s58_s22, 32  ;;  %p2874_p4 = scmp.lt.s32.totalorder %s58_s22, %s58_s22 }
   0xd   :  { %p2870_p3 = scmp.ne.s32.totalorder %s58_s22, %s2869_s14  ;;  %p2875_p5 = scmp.lt.s32.totalorder %s2869_s14, %s2869_s14 }
   0xf   :  { %p2876_p6 = por %p2875_p5, %p2874_p4 }
  0x11   :  { %p2877_p7 = pnand %p2876_p6, %p2870_p3 }
  0x13   :  { %2880 = shalt.err (!%p2877_p7)
}
  0x14   :  { %60 = dma.hbm_to_vmem [thread:$0]  %s3600_s6, 32, %s58_s22, [#allocation8]  }
  0x15   :  { %s2881_s19 = scalar_lea.hbm %s3594_s0, 16 }
  0x16   :  { %p2882_p8 = scmp.ne.s32.totalorder %s3594_s0, %s2881_s19  ;;  %p2885_p9 = scmp.lt.u32.totalorder %s2881_s19, %s3594_s0 }
  0x18   :  { %p2887_p10 = pnand %p2885_p9, %p2882_p8 }
  0x1a   :  { %2890 = shalt.err (!%p2887_p10)
}
  0x1b   :  { %s3013_s26 = smov [#allocation2]   ;;  %s2891_s29 = scalar_lea.hbm %s3597_s3, 512 }
  0x1c   :  { %30 = dma.hbm_to_smem %s3594_s0, 16, %s3013_s26, [#allocation5]  }
  0x1d   :  { %p2892_p11 = scmp.ne.s32.totalorder %s3597_s3, %s2891_s29  ;;  %p2895_p12 = scmp.lt.u32.totalorder %s2891_s29, %s3597_s3 }
  0x1f   :  { %p2897_p13 = pnand %p2895_p12, %p2892_p11 }
  0x21   :  { %2900 = shalt.err (!%p2897_p13)
}
  0x22   :  { %s2901_s16 = scalar_lea.vmem %s41_s24, 512  ;;  %p2906_p1 = scmp.lt.s32.totalorder %s41_s24, %s41_s24 }
  0x23   :  { %p2902_p0 = scmp.ne.s32.totalorder %s41_s24, %s2901_s16  ;;  %p2907_p2 = scmp.lt.s32.totalorder %s2901_s16, %s2901_s16 }
  0x25   :  { %p2908_p3 = por %p2907_p2, %p2906_p1 }
  0x27   :  { %p2909_p4 = pnand %p2908_p3, %p2902_p0 }
  0x29   :  { %2912 = shalt.err (!%p2909_p4)
}
  0x2a   :  { %s3014_s0 = smov 128   ;;  %s3015_s17 = smov 8  }
  0x2b   :  { %46 = dma.hbm_to_vmem [thread:$0]  %s3597_s3, 512, %s41_s24, [#allocation3], %s3014_s0, %s3014_s0, %s3015_s17  }
  0x2c   :  { %s3016_s20 = smov [#allocation9]   ;;  %s2913_s26 = scalar_lea.hbm %s3601_s7, 32 }
  0x2d   :  { %s67_s21 = sshll.u32 %s3016_s20, 4  ;;  %p2914_p5 = scmp.ne.s32.totalorder %s3601_s7, %s2913_s26  ;;  %s68_s21 = int_to_ptr.vmem [resolvable:$true] %s67_s21 }
  0x2e   :  { %p2917_p6 = scmp.lt.u32.totalorder %s2913_s26, %s3601_s7 }
  0x30   :  { %p2919_p7 = pnand %p2917_p6, %p2914_p5 }
  0x32   :  { %2922 = shalt.err (!%p2919_p7)
}
  0x33   :  { %s2923_s29 = scalar_lea.vmem %s68_s21, 32  ;;  %p2928_p9 = scmp.lt.s32.totalorder %s68_s21, %s68_s21 }
  0x34   :  { %p2924_p8 = scmp.ne.s32.totalorder %s68_s21, %s2923_s29  ;;  %p2929_p10 = scmp.lt.s32.totalorder %s2923_s29, %s2923_s29 }
  0x36   :  { %p2930_p11 = por %p2929_p10, %p2928_p9 }
  0x38   :  { %p2931_p12 = pnand %p2930_p11, %p2924_p8 }
  0x3a   :  { %2934 = shalt.err (!%p2931_p12)
}
  0x3b   :  { %70 = dma.hbm_to_vmem [thread:$0]  %s3601_s7, 32, %s68_s21, [#allocation8]  }
  0x3c   :  { %3001 = dma.done.wait [#allocation5], 16  }
  0x3d   :  { %3002 = vsyncadd [#allocation5], 4294967280 }
  0x3e   :  { %3003 = dma.done.wait [#allocation3], 512  }
  0x3f   :  { %3004 = vsyncadd [#allocation3], 4294966784 }
  0x40   :  { %3005 = dma.done.wait [#allocation8], 64  }
  0x41   :  { %3006 = vsyncadd [#allocation8], 4294967232 }
  0x42   :  { %87 = sfence }
  0x43   :  { %v152_v0 = vld [vmem:[%s3596_s2] sm:$0xff]  ;;  %v153_v1 = vld [vmem:[%s3596_s2 + $0x8] sm:$0xff]  ;;  %v3017_v3 = vmov 0.0|0.0   ;;  %v154_v6 = vld [vmem:[%s3596_s2 + $0x10] sm:$0xff]  ;;  %s3153_s18 = sld [smem:[#allocation2]]  ;;  %vm3018_vm0 = vmmov 0  }
  0x44   :  { %v147_v2 = vld [vmem:[#allocation6] sm:$0xff]  ;;  %2560 = vmatprep.subr.bf16.mxu0 %v3017_v3  ;;  %v2561_v4 = vpack.c.bf16 %v153_v1, %v152_v0  ;;  %2566 = vmatprep.subr.bf16.mxu1 %v3017_v3  ;;  %v148_v5 = vld [vmem:[#allocation6 + $0x8] sm:$0xff]  ;;  %v155_v7 = vld [vmem:[%s3596_s2 + $0x18] sm:$0xff]  ;;  %v3019_v11 = vmov 0.0   ;;  %s2133_s19 = sld [smem:[#allocation2 + $0x1]]  ;;  %s2134_s20 = sld [smem:[#allocation2 + $0x2]] }
  0x45   :  { %v3155_v8 = vpack.c.bf16 %v148_v5, %v147_v2  ;;  %v149_v9 = vld [vmem:[#allocation6 + $0x10] sm:$0xff]  ;;  %v150_v10 = vld [vmem:[#allocation6 + $0x18] sm:$0xff]  ;;  %2306 = vmatprep.mubr.msk.f32.mxu0 %vm3018_vm0, %v3019_v11  ;;  %2317 = vmatprep.mubr.msk.f32.mxu1 %vm3018_vm0, %v3019_v11  ;;  %v2564_v12 = vpack.c.bf16 %v155_v7, %v154_v6  ;;  %s2135_s2 = sld [smem:[#allocation2 + $0x3]]  ;;  %s2136_s21 = sld [smem:[#allocation2 + $0x4]]  ;;  %vm133_vm1 = vcmask 1040384   ;;  %vm135_vm2 = vcmask 1041408  }
  0x46   :  { %2562 = vmatpush3.bf16.msra.mxu0 %v2561_v4  ;;  %v3163_v13 = vpack.c.bf16 %v150_v10, %v149_v9  ;;  %s2137_s23 = sld [smem:[#allocation2 + $0x5]]  ;;  %s2138_s25 = sld [smem:[#allocation2 + $0x6]]  ;;  %vm137_vm3 = vcmask 1042432   ;;  %vm160_vm4 = vcmask 261120   ;;  %v234_v14 = vld [vmem:[#allocation7] sm:$0x1] }
  0x47   :  { %2568 = vmatpush3.bf16.msra.mxu1 %v3155_v8  ;;  %2563 = vmatprep.subr.bf16.mxu0 %v3017_v3  ;;  %s3166_s26 = sld [smem:[#allocation2 + $0x7]]  ;;  %vm139_vm5 = vcmask 1043456   ;;  %vm141_vm6 = vcmask 1044480   ;;  %vm143_vm7 = vcmask 1045504   ;;  %vm145_vm8 = vcmask 1046528  }
  0x48   :  { %2569 = vmatprep.subr.bf16.mxu1 %v3017_v3  ;;  %v2140_v39 = vld [vmem:[%s3599_s5] ss:$0 sm:$0xff]  ;;  %v235_v45 = vld [vmem:[#allocation9] sm:$0x1]  ;;  %vm1114_vm9 = vcmask 523264   ;;  %vm1090_vm10 = vcmask 261127  }
  0x49   :  { %s89_s6 = scalar_lea.vmem %s3595_s1, %s3153_s18  ;;  %vm1966_vm11 = vcmask 253952  }
  0x4a   :  { %2565 = vmatpush3.bf16.msra.mxu0 %v2564_v12  ;;  %s92_s3 = scalar_lea.vmem %s3595_s1, %s2133_s19  ;;  %s95_s13 = scalar_lea.vmem %s3595_s1, %s2134_s20  ;;  %v90_v15 = vld [vmem:[%s89_s6] sm:$0x1] }
  0x4b   :  { %2571 = vmatpush3.bf16.msra.mxu1 %v3163_v13  ;;  %2572 = vmatprep.subr.bf16.mxu0 %v3017_v3  ;;  %v93_v16 = vld [vmem:[%s92_s3] sm:$0x1]  ;;  %s98_s7 = scalar_lea.vmem %s3595_s1, %s2135_s2  ;;  %s101_s17 = scalar_lea.vmem %s3595_s1, %s2136_s21 }
  0x4c   :  { %v96_v17 = vld [vmem:[%s95_s13] sm:$0x1]  ;;  %2578 = vmatprep.subr.bf16.mxu1 %v3017_v3  ;;  %s104_s20 = scalar_lea.vmem %s3595_s1, %s2137_s23  ;;  %s107_s6 = scalar_lea.vmem %s3595_s1, %s2138_s25  ;;  %v113_v20 = vrot.slane %v93_v16, 7 }
  0x4d   :  { %v99_v18 = vld [vmem:[%s98_s7] sm:$0x1]  ;;  %v116_v21 = vrot.slane %v96_v17, 6  ;;  %s110_s21 = scalar_lea.vmem %s3595_s1, %s3166_s26  ;;  %s3020_s25 = smov 64  }
  0x4e   :  { %v102_v19 = vld [vmem:[%s101_s17] sm:$0x1]  ;;  %v119_v24 = vrot.slane %v99_v18, 5  ;;  %2318 = vmatmul.mubr.msk.f32.vlgmr.msra.gmra.mrb[0].mxu1 %vm160_vm4, %v234_v14  ;;  %v134_v28 = vsel %vm133_vm1, %v90_v15, %v113_v20  ;;  %s3021_s26 = smov 32  }
  0x4f   :  { %v105_v22 = vld [vmem:[%s104_s20] sm:$0x1]  ;;  %v122_v25 = vrot.slane %v102_v19, 4  ;;  %2580 = vmatpush3.bf16.msra.mxu1 %v3155_v8  ;;  %2339 = vmatprep.mubr.msk.f32.mxu1 %vm3018_vm0, %v3019_v11  ;;  %v136_v30 = vsel %vm135_vm2, %v134_v28, %v116_v21 }
  0x50   :  { %v108_v23 = vld [vmem:[%s107_s6] sm:$0x1]  ;;  %v125_v27 = vrot.slane %v105_v22, 3  ;;  %2581 = vmatprep.subr.bf16.mxu1 %v3017_v3  ;;  %v138_v32 = vsel %vm137_vm3, %v136_v30, %v119_v24 }
  0x51   :  { %v111_v26 = vld [vmem:[%s110_s21] sm:$0x1]  ;;  %v128_v29 = vrot.slane %v108_v23, 2  ;;  %v140_v33 = vsel %vm139_vm5, %v138_v32, %v122_v25 }
  0x52   :  { %v131_v31 = vrot.slane %v111_v26, 1  ;;  %v142_v34 = vsel %vm141_vm6, %v140_v33, %v125_v27 }
  0x53   :  { %2583 = vmatpush3.bf16.msra.mxu1 %v3163_v13  ;;  %v144_v35 = vsel %vm143_vm7, %v142_v34, %v128_v29 }
  0x54   :  { %2590 = vmatprep.subr.bf16.mxu1 %v3017_v3  ;;  %v146_v36 = vsel %vm145_vm8, %v144_v35, %v131_v31 }
  0x55   :  { %2307 = vmatmul.mubr.msk.f32.vlgmr.msra.gmra.mrb[0].mxu0 %vm160_vm4, %v146_v36 }
  0x56   :  { %2574 = vmatpush3.bf16.msra.mxu0 %v3155_v8  ;;  %2328 = vmatprep.mubr.msk.f32.mxu0 %vm3018_vm0, %v3019_v11 }
  0x57   :  { %2575 = vmatprep.subr.bf16.mxu0 %v3017_v3 }
  0x5a   :  { %2577 = vmatpush3.bf16.msra.mxu0 %v3163_v13 }
  0x5b   :  { %2584 = vmatprep.subr.bf16.mxu0 %v3017_v3 }
 0x121   :  { %v305_v37 = vpop.f32.mrb[0].mxu1 }
 0x122   :  { %v2319_v38 = vpop.f32.mrb[1].mxu1 }
 0x128   :  { %v230_v40 = vpop.f32.mrb[0].mxu0 }
 0x129   :  { %v3221_v41 = vadd.f32 %v2140_v39, %v230_v40  ;;  %v2308_v42 = vpop.f32.mrb[1].mxu0 }
 0x12b   :  { %v309_v43 = vadd.f32 %v305_v37, %v3221_v41 }
 0x12d   :  { %2731 = vtanh.f32 %v309_v43  ;;  %v2143_v46 = vmul.f32 -1.442695, %v309_v43 }
 0x12f   :  { %2733 = vpow2.f32 %v2143_v46 }
 0x137   :  { %v2732_v44 = vpop.eup %2731 }
 0x138   :  { %323 = vrot.lane.b32.xlu0 %v2732_v44, %s3020_s25 }
 0x139   :  { %v2734_v47 = vpop.eup %2733 }
 0x13a   :  { %v313_v48 = vadd.f32 1.0, %v2734_v47 }
 0x13c   :  { %318 = vrot.lane.b32.xlu0 %v235_v45, %s3021_s26  ;;  %2735 = vrcp.f32 %v313_v48 }
 0x146   :  { %v2736_v49 = vpop.eup %2735 }
 0x1aa   :  { %v324_v50 = vpop.permute.xlu0 %323 }
 0x1ab   :  { %v326_v51 = vmul.f32 %v2736_v49, %v324_v50 }
 0x1ad   :  { %328 = vrot.lane.b32.xlu1 %v326_v51, %s3021_s26 }
 0x1ae   :  { %v319_v52 = vpop.permute.xlu0 %318 }
 0x1af   :  { %v321_v53 = vmul.f32 %v2736_v49, %v319_v52 }
 0x21f   :  { %v329_v54 = vpop.permute.xlu1 %328 }
 0x220   :  { %v331_v55 = vadd.f32 %v329_v54, %v321_v53 }
 0x222   :  { %2737 = vtanh.f32 %v331_v55  ;;  %v425_v9 = vrot.slane %v331_v55, 7 }
 0x22c   :  { %v2738_v56 = vpop.eup %2737 }
 0x22d   :  { %334 = vrot.lane.b32.xlu1 %v2738_v56, %s3020_s25 }
 0x29f   :  { %v335_v57 = vpop.permute.xlu1 %334 }
 0x2a0   :  { %v337_v58 = vmul.f32 %v2736_v49, %v335_v57 }
 0x2a2   :  { %339 = vrot.lane.b32.xlu0 %v337_v58, %s3021_s26 }
 0x314   :  { %v3229_v59 = vpop.permute.xlu0 %339 }
 0x315   :  { %2329 = vmatmul.mubr.msk.f32.vlgmr.msra.gmra.mrb[2].mxu0 %vm160_vm4, %v3229_v59 }
 0x316   :  { %2586 = vmatpush3.bf16.msra.mxu0 %v3155_v8  ;;  %2350 = vmatprep.mubr.msk.f32.mxu0 %vm3018_vm0, %v3019_v11 }
 0x317   :  { %2587 = vmatprep.subr.bf16.mxu0 %v3017_v3 }
 0x31a   :  { %2589 = vmatpush3.bf16.msra.mxu0 %v3163_v13 }
 0x31b   :  { %2596 = vmatprep.subr.bf16.mxu0 %v3017_v3 }
 0x3e8   :  { %v409_v60 = vpop.f32.mrb[2].mxu0 }
 0x3e9   :  { %v414_v61 = vrot.slane %v409_v60, 7  ;;  %v2330_v62 = vpop.f32.mrb[3].mxu0 }
 0x3eb   :  { %v416_v63 = vadd.f32 %v414_v61, %v3221_v41 }
 0x3ed   :  { %2739 = vtanh.f32 %v416_v63  ;;  %v2145_v1 = vmul.f32 -1.442695, %v416_v63 }
 0x3ef   :  { %2741 = vpow2.f32 %v2145_v1 }
 0x3f7   :  { %v2740_v0 = vpop.eup %2739 }
 0x3f8   :  { %429 = vrot.lane.b32.xlu1 %v2740_v0, %s3020_s25 }
 0x3f9   :  { %v2742_v2 = vpop.eup %2741 }
 0x3fa   :  { %v420_v4 = vadd.f32 1.0, %v2742_v2 }
 0x3fc   :  { %2743 = vrcp.f32 %v420_v4 }
 0x406   :  { %v2744_v5 = vpop.eup %2743 }
 0x407   :  { %v427_v10 = vmul.f32 %v2744_v5, %v425_v9 }
 0x46a   :  { %v430_v6 = vpop.permute.xlu1 %429 }
 0x46b   :  { %v432_v7 = vmul.f32 %v2744_v5, %v430_v6 }
 0x46d   :  { %434 = vrot.lane.b32.xlu0 %v432_v7, %s3021_s26 }
 0x4df   :  { %v435_v12 = vpop.permute.xlu0 %434 }
 0x4e0   :  { %v437_v14 = vadd.f32 %v435_v12, %v427_v10 }
 0x4e2   :  { %2745 = vtanh.f32 %v437_v14  ;;  %v532_v31 = vrot.slane %v437_v14, 7 }
 0x4ec   :  { %v2746_v15 = vpop.eup %2745 }
 0x4ed   :  { %440 = vrot.lane.b32.xlu1 %v2746_v15, %s3020_s25 }
 0x55f   :  { %v441_v16 = vpop.permute.xlu1 %440 }
 0x560   :  { %v3243_v17 = vmul.f32 %v2744_v5, %v441_v16 }
 0x562   :  { %v445_v18 = vrot.slane %v3243_v17, 1 }
 0x564   :  { %446 = vrot.lane.b32.xlu0 %v445_v18, %s3021_s26 }
 0x5d6   :  { %v447_v19 = vpop.permute.xlu0 %446 }
 0x5d7   :  { %2340 = vmatmul.mubr.msk.f32.vlgmr.msra.gmra.mrb[2].mxu1 %vm160_vm4, %v447_v19 }
 0x5d8   :  { %2592 = vmatpush3.bf16.msra.mxu1 %v3155_v8  ;;  %2361 = vmatprep.mubr.msk.f32.mxu1 %vm3018_vm0, %v3019_v11 }
 0x5d9   :  { %2593 = vmatprep.subr.bf16.mxu1 %v3017_v3 }
 0x5dc   :  { %2595 = vmatpush3.bf16.msra.mxu1 %v3163_v13 }
 0x5dd   :  { %2602 = vmatprep.subr.bf16.mxu1 %v3017_v3 }
 0x6aa   :  { %v516_v20 = vpop.f32.mrb[2].mxu1 }
 0x6ab   :  { %v521_v21 = vrot.slane %v516_v20, 6  ;;  %v2341_v22 = vpop.f32.mrb[3].mxu1 }
 0x6ad   :  { %v523_v23 = vadd.f32 %v521_v21, %v3221_v41 }
 0x6af   :  { %2747 = vtanh.f32 %v523_v23  ;;  %v2147_v25 = vmul.f32 -1.442695, %v523_v23 }
 0x6b1   :  { %2749 = vpow2.f32 %v2147_v25 }
 0x6b9   :  { %v2748_v24 = vpop.eup %2747 }
 0x6ba   :  { %536 = vrot.lane.b32.xlu1 %v2748_v24, %s3020_s25 }
 0x6bb   :  { %v2750_v26 = vpop.eup %2749 }
 0x6bc   :  { %v527_v27 = vadd.f32 1.0, %v2750_v26 }
 0x6be   :  { %2751 = vrcp.f32 %v527_v27 }
 0x6c8   :  { %v2752_v28 = vpop.eup %2751 }
 0x6c9   :  { %v534_v32 = vmul.f32 %v2752_v28, %v532_v31 }
 0x72c   :  { %v537_v29 = vpop.permute.xlu1 %536 }
 0x72d   :  { %v539_v30 = vmul.f32 %v2752_v28, %v537_v29 }
 0x72f   :  { %541 = vrot.lane.b32.xlu0 %v539_v30, %s3021_s26 }
 0x7a1   :  { %v542_v33 = vpop.permute.xlu0 %541 }
 0x7a2   :  { %v544_v34 = vadd.f32 %v542_v33, %v534_v32 }
 0x7a4   :  { %2753 = vtanh.f32 %v544_v34  ;;  %v639_v52 = vrot.slane %v544_v34, 7 }
 0x7ae   :  { %v2754_v35 = vpop.eup %2753 }
 0x7af   :  { %547 = vrot.lane.b32.xlu1 %v2754_v35, %s3020_s25 }
 0x821   :  { %v548_v36 = vpop.permute.xlu1 %547 }
 0x822   :  { %v3258_v37 = vmul.f32 %v2752_v28, %v548_v36 }
 0x824   :  { %v552_v38 = vrot.slane %v3258_v37, 2 }
 0x826   :  { %553 = vrot.lane.b32.xlu0 %v552_v38, %s3021_s26  ;;  %v1106_v38 = vld [vmem:[#allocation7 + $0x1] sm:$0x1] }
 0x898   :  { %v554_v39 = vpop.permute.xlu0 %553 }
 0x899   :  { %2351 = vmatmul.mubr.msk.f32.vlgmr.msra.gmra.mrb[4].mxu0 %vm160_vm4, %v554_v39 }
 0x89a   :  { %2598 = vmatpush3.bf16.msra.mxu0 %v3155_v8  ;;  %2372 = vmatprep.mubr.msk.f32.mxu0 %vm3018_vm0, %v3019_v11 }
 0x89b   :  { %2599 = vmatprep.subr.bf16.mxu0 %v3017_v3 }
 0x89e   :  { %2601 = vmatpush3.bf16.msra.mxu0 %v3163_v13 }
 0x89f   :  { %2608 = vmatprep.subr.bf16.mxu0 %v3017_v3 }
 0x96c   :  { %v623_v40 = vpop.f32.mrb[4].mxu0 }
 0x96d   :  { %v628_v42 = vrot.slane %v623_v40, 5  ;;  %v2352_v43 = vpop.f32.mrb[5].mxu0 }
 0x96e   :  { %v1097_v43 = vld [vmem:[%s3598_s4] sm:$0xff] }
 0x96f   :  { %v630_v44 = vadd.f32 %v628_v42, %v3221_v41 }
 0x971   :  { %2755 = vtanh.f32 %v630_v44  ;;  %v2149_v46 = vmul.f32 -1.442695, %v630_v44  ;;  %v1098_v44 = vld [vmem:[%s3598_s4 + $0x8] sm:$0xff] }
 0x973   :  { %2757 = vpow2.f32 %v2149_v46  ;;  %v1099_v46 = vld [vmem:[%s3598_s4 + $0x10] sm:$0xff] }
 0x97b   :  { %v2756_v45 = vpop.eup %2755 }
 0x97c   :  { %643 = vrot.lane.b32.xlu1 %v2756_v45, %s3020_s25  ;;  %v3317_v45 = vpack.c.bf16 %v1098_v44, %v1097_v43 }
 0x97d   :  { %v2758_v47 = vpop.eup %2757 }
 0x97e   :  { %v634_v48 = vadd.f32 1.0, %v2758_v47  ;;  %v1100_v47 = vld [vmem:[%s3598_s4 + $0x18] sm:$0xff] }
 0x980   :  { %2759 = vrcp.f32 %v634_v48 }
 0x98a   :  { %v2760_v49 = vpop.eup %2759 }
 0x98b   :  { %v641_v53 = vmul.f32 %v2760_v49, %v639_v52 }
 0x9ee   :  { %v644_v50 = vpop.permute.xlu1 %643 }
 0x9ef   :  { %v646_v51 = vmul.f32 %v2760_v49, %v644_v50  ;;  %v1101_v50 = vld [vmem:[%s3598_s4 + $0x20] sm:$0xff] }
 0x9f1   :  { %648 = vrot.lane.b32.xlu0 %v646_v51, %s3021_s26  ;;  %v1102_v51 = vld [vmem:[%s3598_s4 + $0x28] sm:$0xff] }
 0x9f2   :  { %v3339_v52 = vpack.c.bf16 %v1102_v51, %v1101_v50 }
 0xa63   :  { %v649_v54 = vpop.permute.xlu0 %648 }
 0xa64   :  { %v651_v55 = vadd.f32 %v649_v54, %v641_v53  ;;  %v1103_v53 = vld [vmem:[%s3598_s4 + $0x30] sm:$0xff]  ;;  %v1104_v54 = vld [vmem:[%s3598_s4 + $0x38] sm:$0xff] }
 0xa66   :  { %2761 = vtanh.f32 %v651_v55  ;;  %v746_v12 = vrot.slane %v651_v55, 7  ;;  %v3349_v55 = vpack.c.bf16 %v1104_v54, %v1103_v53 }
 0xa70   :  { %v2762_v56 = vpop.eup %2761 }
 0xa71   :  { %654 = vrot.lane.b32.xlu1 %v2762_v56, %s3020_s25 }
 0xae3   :  { %v655_v57 = vpop.permute.xlu1 %654 }
 0xae4   :  { %v3273_v58 = vmul.f32 %v2760_v49, %v655_v57  ;;  %v3327_v49 = vpack.c.bf16 %v1100_v47, %v1099_v46 }
 0xae6   :  { %v659_v60 = vrot.slane %v3273_v58, 3 }
 0xae8   :  { %660 = vrot.lane.b32.xlu0 %v659_v60, %s3021_s26 }
 0xb5a   :  { %v661_v61 = vpop.permute.xlu0 %660 }
 0xb5b   :  { %2362 = vmatmul.mubr.msk.f32.vlgmr.msra.gmra.mrb[4].mxu1 %vm160_vm4, %v661_v61 }
 0xb5c   :  { %2604 = vmatpush3.bf16.msra.mxu1 %v3155_v8  ;;  %2383 = vmatprep.mubr.msk.f32.mxu1 %vm3018_vm0, %v3019_v11 }
 0xb5d   :  { %2605 = vmatprep.subr.bf16.mxu1 %v3017_v3 }
 0xb60   :  { %2607 = vmatpush3.bf16.msra.mxu1 %v3163_v13 }
 0xb61   :  { %2614 = vmatprep.subr.bf16.mxu1 %v3017_v3 }
 0xc2e   :  { %v730_v62 = vpop.f32.mrb[4].mxu1 }
 0xc2f   :  { %v735_v63 = vrot.slane %v730_v62, 4  ;;  %v2363_v0 = vpop.f32.mrb[5].mxu1 }
 0xc31   :  { %v737_v1 = vadd.f32 %v735_v63, %v3221_v41  ;;  %v3371_v63 = vld [vmem:[%s3599_s5 + $0x1] sm:$0x1] }
 0xc33   :  { %2763 = vtanh.f32 %v737_v1  ;;  %v2151_v4 = vmul.f32 -1.442695, %v737_v1 }
 0xc35   :  { %2765 = vpow2.f32 %v2151_v4 }
 0xc3d   :  { %v2764_v2 = vpop.eup %2763 }
 0xc3e   :  { %750 = vrot.lane.b32.xlu1 %v2764_v2, %s3020_s25 }
 0xc3f   :  { %v2766_v5 = vpop.eup %2765 }
 0xc40   :  { %v741_v6 = vadd.f32 1.0, %v2766_v5 }
 0xc42   :  { %2767 = vrcp.f32 %v741_v6  ;;  %v1107_v6 = vld [vmem:[#allocation9 + $0x1] sm:$0x1] }
 0xc4c   :  { %v2768_v7 = vpop.eup %2767 }
 0xc4d   :  { %v748_v14 = vmul.f32 %v2768_v7, %v746_v12 }
 0xcb0   :  { %v751_v9 = vpop.permute.xlu1 %750 }
 0xcb1   :  { %v753_v10 = vmul.f32 %v2768_v7, %v751_v9 }
 0xcb3   :  { %755 = vrot.lane.b32.xlu0 %v753_v10, %s3021_s26 }
 0xd25   :  { %v756_v15 = vpop.permute.xlu0 %755 }
 0xd26   :  { %v758_v16 = vadd.f32 %v756_v15, %v748_v14 }
 0xd28   :  { %2769 = vtanh.f32 %v758_v16 }
 0xd32   :  { %v2770_v18 = vpop.eup %2769 }
 0xd33   :  { %761 = vrot.lane.b32.xlu1 %v2770_v18, %s3020_s25 }
 0xda5   :  { %v762_v19 = vpop.permute.xlu1 %761 }
 0xda6   :  { %v3288_v20 = vmul.f32 %v2768_v7, %v762_v19 }
 0xda8   :  { %v766_v21 = vrot.slane %v3288_v20, 4 }
 0xdaa   :  { %767 = vrot.lane.b32.xlu0 %v766_v21, %s3021_s26 }
 0xe1c   :  { %v768_v22 = vpop.permute.xlu0 %767 }
 0xe1d   :  { %2373 = vmatmul.mubr.msk.f32.vlgmr.msra.gmra.mrb[6].mxu0 %vm160_vm4, %v768_v22 }
 0xe1e   :  { %2610 = vmatpush3.bf16.msra.mxu0 %v3155_v8  ;;  %2394 = vmatprep.mubr.msk.f32.mxu0 %vm3018_vm0, %v3019_v11 }
 0xe1f   :  { %2611 = vmatprep.subr.bf16.mxu0 %v3017_v3 }
 0xe22   :  { %2613 = vmatpush3.bf16.msra.mxu0 %v3163_v13  ;;  %v853_v13 = vrot.slane %v758_v16, 7 }
 0xe23   :  { %2626 = vmatprep.subr.bf16.mxu0 %v3017_v3 }
 0xef0   :  { %v837_v23 = vpop.f32.mrb[6].mxu0 }
 0xef1   :  { %v842_v24 = vrot.slane %v837_v23, 3  ;;  %v2374_v25 = vpop.f32.mrb[7].mxu0 }
 0xef3   :  { %v844_v26 = vadd.f32 %v842_v24, %v3221_v41 }
 0xef5   :  { %2771 = vtanh.f32 %v844_v26  ;;  %v2153_v28 = vmul.f32 -1.442695, %v844_v26 }
 0xef7   :  { %2773 = vpow2.f32 %v2153_v28 }
 0xeff   :  { %v2772_v27 = vpop.eup %2771 }
 0xf00   :  { %857 = vrot.lane.b32.xlu1 %v2772_v27, %s3020_s25 }
 0xf01   :  { %v2774_v8 = vpop.eup %2773 }
 0xf02   :  { %v848_v29 = vadd.f32 1.0, %v2774_v8 }
 0xf04   :  { %2775 = vrcp.f32 %v848_v29 }
 0xf0e   :  { %v2776_v30 = vpop.eup %2775 }
 0xf0f   :  { %v855_v33 = vmul.f32 %v2776_v30, %v853_v13 }
 0xf72   :  { %v858_v31 = vpop.permute.xlu1 %857 }
 0xf73   :  { %v860_v32 = vmul.f32 %v2776_v30, %v858_v31 }
 0xf75   :  { %862 = vrot.lane.b32.xlu0 %v860_v32, %s3021_s26 }
 0xfe7   :  { %v863_v34 = vpop.permute.xlu0 %862 }
 0xfe8   :  { %v3302_v35 = vadd.f32 %v863_v34, %v855_v33 }
 0xfea   :  { %2777 = vtanh.f32 %v3302_v35  ;;  %v960_v24 = vrot.slane %v3302_v35, 7 }
 0xff4   :  { %v2778_v36 = vpop.eup %2777 }
 0xff5   :  { %868 = vrot.lane.b32.xlu1 %v2778_v36, %s3020_s25 }
 0xff9   :  { %1110 = vrot.lane.b32.xlu1 %v1106_v38, %s3021_s26 }
0x1067   :  { %v869_v39 = vpop.permute.xlu1 %868 }
0x1068   :  { %v3307_v40 = vmul.f32 %v2776_v30, %v869_v39 }
0x106a   :  { %v873_v42 = vrot.slane %v3307_v40, 5 }
0x106b   :  { %v1111_v56 = vpop.permute.xlu1 %1110 }
0x106c   :  { %874 = vrot.lane.b32.xlu0 %v873_v42, %s3021_s26  ;;  %v1113_v57 = vsel %vm160_vm4, %v3229_v59, %v1111_v56 }
0x10de   :  { %v875_v48 = vpop.permute.xlu0 %874 }
0x10df   :  { %2384 = vmatmul.mubr.msk.f32.vlgmr.msra.gmra.mrb[6].mxu1 %vm160_vm4, %v875_v48 }
0x10e0   :  { %2616 = vmatpush3.bf16.msra.mxu1 %v3317_v45  ;;  %2413 = vmatprep.mubr.msk.f32.mxu1 %vm3018_vm0, %v3019_v11 }
0x10e1   :  { %2617 = vmatprep.subr.bf16.mxu1 %v3017_v3 }
0x10e4   :  { %2619 = vmatpush3.bf16.msra.mxu1 %v3327_v49 }
0x10e5   :  { %2620 = vmatprep.subr.bf16.mxu1 %v3017_v3 }
0x10e8   :  { %2622 = vmatpush3.bf16.msra.mxu1 %v3339_v52 }
0x10e9   :  { %2623 = vmatprep.subr.bf16.mxu1 %v3017_v3 }
0x10ec   :  { %2625 = vmatpush3.bf16.msra.mxu1 %v3349_v55 }
0x10ed   :  { %2638 = vmatprep.subr.bf16.mxu1 %v3017_v3 }
0x10ef   :  { %2414 = vmatmul.mubr.msk.f32.vlgmr.msra.gmra.mrb[8].mxu1 %vm1114_vm9, %v1113_v57 }
0x10f0   :  { %2640 = vmatpush3.bf16.msra.mxu1 %v3317_v45  ;;  %2451 = vmatprep.mubr.msk.f32.mxu1 %vm3018_vm0, %v3019_v11 }
0x10f1   :  { %2641 = vmatprep.subr.bf16.mxu1 %v3017_v3 }
0x10f4   :  { %2643 = vmatpush3.bf16.msra.mxu1 %v3327_v49 }
0x10f5   :  { %2644 = vmatprep.subr.bf16.mxu1 %v3017_v3 }
0x10f8   :  { %2646 = vmatpush3.bf16.msra.mxu1 %v3339_v52 }
0x10f9   :  { %2647 = vmatprep.subr.bf16.mxu1 %v3017_v3 }
0x10fc   :  { %2649 = vmatpush3.bf16.msra.mxu1 %v3349_v55 }
0x10fd   :  { %2662 = vmatprep.subr.bf16.mxu1 %v3017_v3 }
0x11b2   :  { %v944_v59 = vpop.f32.mrb[6].mxu1 }
0x11b3   :  { %v949_v60 = vrot.slane %v944_v59, 2  ;;  %v2385_v61 = vpop.f32.mrb[7].mxu1 }
0x11b5   :  { %v951_v62 = vadd.f32 %v949_v60, %v3221_v41 }
0x11b7   :  { %2779 = vtanh.f32 %v951_v62  ;;  %v2155_v7 = vmul.f32 -1.442695, %v951_v62 }
0x11c1   :  { %v2780_v0 = vpop.eup %2779 }
0x11c2   :  { %v1184_v1 = vpop.f32.mrb[8].mxu1  ;;  %964 = vrot.lane.b32.xlu0 %v2780_v0, %s3020_s25 }
0x11c3   :  { %v1185_v2 = vadd.f32 %v1184_v1, %v3371_v63  ;;  %v2415_v4 = vpop.f32.mrb[9].mxu1 }
0x11c5   :  { %2781 = vtanh.f32 %v1185_v2  ;;  %v2159_v10 = vmul.f32 -1.442695, %v1185_v2 }
0x11c6   :  { %2783 = vpow2.f32 %v2155_v7 }
0x11c7   :  { %2785 = vpow2.f32 %v2159_v10 }
0x11cf   :  { %v2782_v5 = vpop.eup %2781 }
0x11d0   :  { %1201 = vrot.lane.b32.xlu1 %v2782_v5, %s3020_s25  ;;  %v2784_v9 = vpop.eup %2783 }
0x11d1   :  { %v955_v12 = vadd.f32 1.0, %v2784_v9  ;;  %v2786_v14 = vpop.eup %2785 }
0x11d2   :  { %v1191_v16 = vadd.f32 1.0, %v2786_v14 }
0x11d3   :  { %2787 = vrcp.f32 %v955_v12 }
0x11d4   :  { %1196 = vrot.lane.b32.xlu1 %v1107_v6, %s3021_s26  ;;  %2789 = vrcp.f32 %v1191_v16 }
0x11dd   :  { %v2788_v15 = vpop.eup %2787 }
0x11de   :  { %v2790_v21 = vpop.eup %2789  ;;  %v962_v25 = vmul.f32 %v2788_v15, %v960_v24 }
0x1234   :  { %v965_v18 = vpop.permute.xlu0 %964 }
0x1235   :  { %v967_v19 = vmul.f32 %v2788_v15, %v965_v18 }
0x1237   :  { %969 = vrot.lane.b32.xlu0 %v967_v19, %s3021_s26 }
0x1242   :  { %v1202_v22 = vpop.permute.xlu1 %1201 }
0x1243   :  { %v1204_v23 = vmul.f32 %v2790_v21, %v1202_v22 }
0x1245   :  { %1206 = vrot.lane.b32.xlu0 %v1204_v23, %s3021_s26 }
0x1246   :  { %v1197_v28 = vpop.permute.xlu1 %1196 }
0x1247   :  { %v1199_v29 = vmul.f32 %v2790_v21, %v1197_v28 }
0x12a9   :  { %v970_v26 = vpop.permute.xlu0 %969 }
0x12aa   :  { %v3380_v27 = vadd.f32 %v970_v26, %v962_v25 }
0x12ac   :  { %2791 = vtanh.f32 %v3380_v27 }
0x12b6   :  { %v2792_v8 = vpop.eup %2791 }
0x12b7   :  { %v1207_v30 = vpop.permute.xlu0 %1206  ;;  %975 = vrot.lane.b32.xlu1 %v2792_v8, %s3020_s25 }
0x12b8   :  { %v1209_v31 = vadd.f32 %v1207_v30, %v1199_v29 }
0x12ba   :  { %2793 = vtanh.f32 %v1209_v31 }
0x12c4   :  { %v2794_v32 = vpop.eup %2793 }
0x12c5   :  { %1212 = vrot.lane.b32.xlu0 %v2794_v32, %s3020_s25 }
0x12c9   :  { %1216 = vrot.lane.b32.xlu0 %v3243_v17, %s3021_s26 }
0x1329   :  { %v976_v13 = vpop.permute.xlu1 %975 }
0x132a   :  { %v3387_v33 = vmul.f32 %v2788_v15, %v976_v13 }
0x132c   :  { %v980_v34 = vrot.slane %v3387_v33, 6 }
0x132e   :  { %981 = vrot.lane.b32.xlu1 %v980_v34, %s3021_s26 }
0x1337   :  { %v1213_v35 = vpop.permute.xlu0 %1212 }
0x1338   :  { %v3391_v36 = vmul.f32 %v2790_v21, %v1213_v35 }
0x133a   :  { %v1220_v38 = vrot.slane %v3391_v36, 7 }
0x133b   :  { %v1217_v17 = vpop.permute.xlu0 %1216 }
0x133c   :  { %1221 = vrot.lane.b32.xlu1 %v1220_v38, %s3020_s25 }
0x13a0   :  { %v982_v39 = vpop.permute.xlu1 %981 }
0x13a1   :  { %2395 = vmatmul.mubr.msk.f32.vlgmr.msra.gmra.mrb[8].mxu0 %vm160_vm4, %v982_v39 }
0x13a2   :  { %2628 = vmatpush3.bf16.msra.mxu0 %v3317_v45  ;;  %2432 = vmatprep.mubr.msk.f32.mxu0 %vm3018_vm0, %v3019_v11 }
0x13a3   :  { %2629 = vmatprep.subr.bf16.mxu0 %v3017_v3 }
0x13a6   :  { %2631 = vmatpush3.bf16.msra.mxu0 %v3327_v49 }
0x13a7   :  { %2632 = vmatprep.subr.bf16.mxu0 %v3017_v3 }
0x13aa   :  { %2634 = vmatpush3.bf16.msra.mxu0 %v3339_v52 }
0x13ab   :  { %2635 = vmatprep.subr.bf16.mxu0 %v3017_v3 }
0x13ae   :  { %v1222_v42 = vpop.permute.xlu1 %1221  ;;  %2637 = vmatpush3.bf16.msra.mxu0 %v3349_v55 }
0x13af   :  { %v1224_v43 = vsel %vm160_vm4, %v1217_v17, %v1222_v42  ;;  %2650 = vmatprep.subr.bf16.mxu0 %v3017_v3 }
0x13b0   :  { %v1226_v44 = vrot.slane %v1224_v43, 1 }
0x13b2   :  { %2433 = vmatmul.mubr.msk.f32.vlgmr.msra.gmra.mrb[10].mxu0 %vm1114_vm9, %v1226_v44 }
0x13b3   :  { %2652 = vmatpush3.bf16.msra.mxu0 %v3317_v45  ;;  %2470 = vmatprep.mubr.msk.f32.mxu0 %vm3018_vm0, %v3019_v11 }
0x13b4   :  { %2653 = vmatprep.subr.bf16.mxu0 %v3017_v3 }
0x13b7   :  { %2655 = vmatpush3.bf16.msra.mxu0 %v3327_v49 }
0x13b8   :  { %2656 = vmatprep.subr.bf16.mxu0 %v3017_v3 }
0x13bb   :  { %2658 = vmatpush3.bf16.msra.mxu0 %v3339_v52 }
0x13bc   :  { %2659 = vmatprep.subr.bf16.mxu0 %v3017_v3 }
0x13bf   :  { %2661 = vmatpush3.bf16.msra.mxu0 %v3349_v55 }
0x13c0   :  { %2674 = vmatprep.subr.bf16.mxu0 %v3017_v3 }
0x1474   :  { %v3418_v46 = vpop.f32.mrb[8].mxu0 }
0x1475   :  { %v2396_v47 = vpop.f32.mrb[9].mxu0 }
0x1485   :  { %v1295_v48 = vpop.f32.mrb[10].mxu0 }
0x1486   :  { %v1296_v50 = vadd.f32 %v1295_v48, %v3371_v63  ;;  %v2434_v51 = vpop.f32.mrb[11].mxu0 }
0x1488   :  { %2795 = vtanh.f32 %v1296_v50  ;;  %v2161_v54 = vmul.f32 -1.442695, %v1296_v50 }
0x148a   :  { %2797 = vpow2.f32 %v2161_v54 }
0x1492   :  { %v2796_v53 = vpop.eup %2795 }
0x1493   :  { %1308 = vrot.lane.b32.xlu0 %v2796_v53, %s3020_s25 }
0x1494   :  { %v2798_v56 = vpop.eup %2797 }
0x1495   :  { %v1302_v57 = vadd.f32 1.0, %v2798_v56 }
0x1497   :  { %2799 = vrcp.f32 %v1302_v57 }
0x14a1   :  { %v2800_v59 = vpop.eup %2799 }
0x14a2   :  { %v1306_v62 = vmul.f32 %v2800_v59, %v1209_v31 }
0x1505   :  { %v1309_v60 = vpop.permute.xlu0 %1308 }
0x1506   :  { %v1311_v61 = vmul.f32 %v2800_v59, %v1309_v60 }
0x1508   :  { %1313 = vrot.lane.b32.xlu1 %v1311_v61, %s3021_s26 }
0x150c   :  { %1323 = vrot.lane.b32.xlu1 %v3258_v37, %s3021_s26 }
0x157a   :  { %v1314_v0 = vpop.permute.xlu1 %1313 }
0x157b   :  { %v1316_v1 = vadd.f32 %v1314_v0, %v1306_v62 }
0x157d   :  { %2801 = vtanh.f32 %v1316_v1 }
0x157e   :  { %v1324_v7 = vpop.permute.xlu1 %1323 }
0x1587   :  { %v2802_v2 = vpop.eup %2801 }
0x1588   :  { %1319 = vrot.lane.b32.xlu0 %v2802_v2, %s3020_s25 }
0x15fa   :  { %v1320_v4 = vpop.permute.xlu0 %1319 }
0x15fb   :  { %v1322_v5 = vmul.f32 %v2800_v59, %v1320_v4 }
0x15fd   :  { %v1327_v6 = vrot.slane %v1322_v5, 6  ;;  %v1973_v29 = vrot.slane %v1322_v5, 7 }
0x15ff   :  { %1328 = vrot.lane.b32.xlu0 %v1327_v6, %s3020_s25  ;;  %v1987_v34 = vsel %vm133_vm1, %v3391_v36, %v1973_v29 }
0x1671   :  { %v1329_v9 = vpop.permute.xlu0 %1328 }
0x1672   :  { %v1331_v10 = vsel %vm160_vm4, %v1324_v7, %v1329_v9 }
0x1673   :  { %v1333_v12 = vrot.slane %v1331_v10, 2 }
0x1675   :  { %2452 = vmatmul.mubr.msk.f32.vlgmr.msra.gmra.mrb[10].mxu1 %vm1114_vm9, %v1333_v12 }
0x1676   :  { %2664 = vmatpush3.bf16.msra.mxu1 %v3317_v45  ;;  %2489 = vmatprep.mubr.msk.f32.mxu1 %vm3018_vm0, %v3019_v11 }
0x1677   :  { %2665 = vmatprep.subr.bf16.mxu1 %v3017_v3 }
0x167a   :  { %2667 = vmatpush3.bf16.msra.mxu1 %v3327_v49 }
0x167b   :  { %2668 = vmatprep.subr.bf16.mxu1 %v3017_v3 }
0x167e   :  { %2670 = vmatpush3.bf16.msra.mxu1 %v3339_v52 }
0x167f   :  { %2671 = vmatprep.subr.bf16.mxu1 %v3017_v3 }
0x1682   :  { %2673 = vmatpush3.bf16.msra.mxu1 %v3349_v55 }
0x1683   :  { %2686 = vmatprep.subr.bf16.mxu1 %v3017_v3 }
0x1748   :  { %v1402_v37 = vpop.f32.mrb[10].mxu1 }
0x1749   :  { %v1403_v14 = vadd.f32 %v1402_v37, %v3371_v63  ;;  %v2453_v15 = vpop.f32.mrb[11].mxu1 }
0x174b   :  { %2803 = vtanh.f32 %v1403_v14  ;;  %v2163_v18 = vmul.f32 -1.442695, %v1403_v14 }
0x174d   :  { %2805 = vpow2.f32 %v2163_v18 }
0x1755   :  { %v2804_v16 = vpop.eup %2803 }
0x1756   :  { %1415 = vrot.lane.b32.xlu1 %v2804_v16, %s3020_s25 }
0x1757   :  { %v2806_v19 = vpop.eup %2805 }
0x1758   :  { %v1409_v21 = vadd.f32 1.0, %v2806_v19 }
0x175a   :  { %2807 = vrcp.f32 %v1409_v21 }
0x1764   :  { %v2808_v22 = vpop.eup %2807 }
0x1765   :  { %v1413_v25 = vmul.f32 %v2808_v22, %v1316_v1 }
0x17c8   :  { %v1416_v23 = vpop.permute.xlu1 %1415 }
0x17c9   :  { %v1418_v24 = vmul.f32 %v2808_v22, %v1416_v23 }
0x17cb   :  { %1420 = vrot.lane.b32.xlu0 %v1418_v24, %s3021_s26 }
0x17cf   :  { %1430 = vrot.lane.b32.xlu0 %v3273_v58, %s3021_s26 }
0x183d   :  { %v1421_v26 = vpop.permute.xlu0 %1420 }
0x183e   :  { %v1423_v28 = vadd.f32 %v1421_v26, %v1413_v25 }
0x1840   :  { %2809 = vtanh.f32 %v1423_v28 }
0x1841   :  { %v1431_v58 = vpop.permute.xlu0 %1430 }
0x184a   :  { %v2810_v8 = vpop.eup %2809 }
0x184b   :  { %1426 = vrot.lane.b32.xlu1 %v2810_v8, %s3020_s25 }
0x18bd   :  { %v1427_v30 = vpop.permute.xlu1 %1426 }
0x18be   :  { %v1429_v31 = vmul.f32 %v2808_v22, %v1427_v30 }
0x18c0   :  { %v1434_v32 = vrot.slane %v1429_v31, 5  ;;  %v1975_v13 = vrot.slane %v1429_v31, 6 }
0x18c2   :  { %v1988_v35 = vsel %vm135_vm2, %v1987_v34, %v1975_v13  ;;  %1435 = vrot.lane.b32.xlu1 %v1434_v32, %s3020_s25 }
0x1934   :  { %v1436_v38 = vpop.permute.xlu1 %1435 }
0x1935   :  { %v1438_v39 = vsel %vm160_vm4, %v1431_v58, %v1436_v38 }
0x1936   :  { %v1440_v17 = vrot.slane %v1438_v39, 3 }
0x1938   :  { %2471 = vmatmul.mubr.msk.f32.vlgmr.msra.gmra.mrb[12].mxu0 %vm1114_vm9, %v1440_v17 }
0x1939   :  { %2676 = vmatpush3.bf16.msra.mxu0 %v3317_v45  ;;  %2508 = vmatprep.mubr.msk.f32.mxu0 %vm3018_vm0, %v3019_v11 }
0x193a   :  { %2677 = vmatprep.subr.bf16.mxu0 %v3017_v3 }
0x193d   :  { %2679 = vmatpush3.bf16.msra.mxu0 %v3327_v49 }
0x193e   :  { %2680 = vmatprep.subr.bf16.mxu0 %v3017_v3 }
0x1941   :  { %2682 = vmatpush3.bf16.msra.mxu0 %v3339_v52 }
0x1942   :  { %2683 = vmatprep.subr.bf16.mxu0 %v3017_v3 }
0x1945   :  { %2685 = vmatpush3.bf16.msra.mxu0 %v3349_v55 }
0x1946   :  { %2698 = vmatprep.subr.bf16.mxu0 %v3017_v3 }
0x1a0b   :  { %v1509_v36 = vpop.f32.mrb[12].mxu0 }
0x1a0c   :  { %v1510_v42 = vadd.f32 %v1509_v36, %v3371_v63  ;;  %v2472_v43 = vpop.f32.mrb[13].mxu0 }
0x1a0e   :  { %2811 = vtanh.f32 %v1510_v42  ;;  %v2165_v47 = vmul.f32 -1.442695, %v1510_v42 }
0x1a10   :  { %2813 = vpow2.f32 %v2165_v47 }
0x1a18   :  { %v2812_v44 = vpop.eup %2811 }
0x1a19   :  { %1522 = vrot.lane.b32.xlu0 %v2812_v44, %s3020_s25  ;;  %v1056_v44 = vrot.slane %v3418_v46, 1 }
0x1a1a   :  { %v2814_v48 = vpop.eup %2813 }
0x1a1b   :  { %v1516_v50 = vadd.f32 1.0, %v2814_v48  ;;  %v1058_v47 = vadd.f32 %v1056_v44, %v3221_v41 }
0x1a1d   :  { %2815 = vrcp.f32 %v1516_v50 }
0x1a27   :  { %v2816_v51 = vpop.eup %2815 }
0x1a28   :  { %v1520_v56 = vmul.f32 %v2816_v51, %v1423_v28 }
0x1a8b   :  { %v1523_v53 = vpop.permute.xlu0 %1522 }
0x1a8c   :  { %v1525_v54 = vmul.f32 %v2816_v51, %v1523_v53 }
0x1a8e   :  { %1527 = vrot.lane.b32.xlu1 %v1525_v54, %s3021_s26 }
0x1a92   :  { %1537 = vrot.lane.b32.xlu1 %v3288_v20, %s3021_s26 }
0x1b00   :  { %v1528_v57 = vpop.permute.xlu1 %1527 }
0x1b01   :  { %v1530_v59 = vadd.f32 %v1528_v57, %v1520_v56  ;;  %v2157_v56 = vmul.f32 -1.442695, %v1058_v47 }
0x1b03   :  { %2817 = vtanh.f32 %v1530_v59 }
0x1b04   :  { %v1538_v4 = vpop.permute.xlu1 %1537 }
0x1b0d   :  { %v2818_v60 = vpop.eup %2817 }
0x1b0e   :  { %1533 = vrot.lane.b32.xlu0 %v2818_v60, %s3020_s25 }
0x1b80   :  { %v1534_v61 = vpop.permute.xlu0 %1533 }
0x1b81   :  { %v1536_v62 = vmul.f32 %v2816_v51, %v1534_v61 }
0x1b83   :  { %v1541_v0 = vrot.slane %v1536_v62, 4  ;;  %v1977_v1 = vrot.slane %v1536_v62, 5 }
0x1b85   :  { %v1989_v2 = vsel %vm137_vm3, %v1988_v35, %v1977_v1  ;;  %1542 = vrot.lane.b32.xlu0 %v1541_v0, %s3020_s25 }
0x1bf7   :  { %v1543_v5 = vpop.permute.xlu0 %1542 }
0x1bf8   :  { %v1545_v6 = vsel %vm160_vm4, %v1538_v4, %v1543_v5 }
0x1bf9   :  { %v1547_v20 = vrot.slane %v1545_v6, 4 }
0x1bfb   :  { %2490 = vmatmul.mubr.msk.f32.vlgmr.msra.gmra.mrb[12].mxu1 %vm1114_vm9, %v1547_v20 }
0x1bfc   :  { %2688 = vmatpush3.bf16.msra.mxu1 %v3317_v45  ;;  %2527 = vmatprep.mubr.msk.f32.mxu1 %vm3018_vm0, %v3019_v11 }
0x1bfd   :  { %2689 = vmatprep.subr.bf16.mxu1 %v3017_v3 }
0x1c00   :  { %2691 = vmatpush3.bf16.msra.mxu1 %v3327_v49 }
0x1c01   :  { %2692 = vmatprep.subr.bf16.mxu1 %v3017_v3 }
0x1c04   :  { %2694 = vmatpush3.bf16.msra.mxu1 %v3339_v52 }
0x1c05   :  { %2695 = vmatprep.subr.bf16.mxu1 %v3017_v3 }
0x1c08   :  { %2697 = vmatpush3.bf16.msra.mxu1 %v3349_v55 }
0x1c09   :  { %2710 = vmatprep.subr.bf16.mxu1 %v3017_v3 }
0x1cce   :  { %v1616_v7 = vpop.f32.mrb[12].mxu1 }
0x1ccf   :  { %v1617_v9 = vadd.f32 %v1616_v7, %v3371_v63  ;;  %v2491_v10 = vpop.f32.mrb[13].mxu1 }
0x1cd1   :  { %2819 = vtanh.f32 %v1617_v9  ;;  %v2167_v37 = vmul.f32 -1.442695, %v1617_v9 }
0x1cd3   :  { %2821 = vpow2.f32 %v2167_v37 }
0x1cdb   :  { %v2820_v12 = vpop.eup %2819 }
0x1cdc   :  { %1629 = vrot.lane.b32.xlu1 %v2820_v12, %s3020_s25 }
0x1cdd   :  { %v2822_v14 = vpop.eup %2821 }
0x1cde   :  { %v1623_v15 = vadd.f32 1.0, %v2822_v14 }
0x1ce0   :  { %2823 = vrcp.f32 %v1623_v15 }
0x1cea   :  { %v2824_v16 = vpop.eup %2823 }
0x1ceb   :  { %v1627_v21 = vmul.f32 %v2824_v16, %v1530_v59 }
0x1d4e   :  { %v1630_v18 = vpop.permute.xlu1 %1629 }
0x1d4f   :  { %v1632_v19 = vmul.f32 %v2824_v16, %v1630_v18 }
0x1d51   :  { %1634 = vrot.lane.b32.xlu0 %v1632_v19, %s3021_s26 }
0x1d55   :  { %1644 = vrot.lane.b32.xlu0 %v3307_v40, %s3021_s26 }
0x1dc3   :  { %v1635_v22 = vpop.permute.xlu0 %1634 }
0x1dc4   :  { %v1637_v23 = vadd.f32 %v1635_v22, %v1627_v21 }
0x1dc6   :  { %2825 = vtanh.f32 %v1637_v23 }
0x1dc7   :  { %v1645_v30 = vpop.permute.xlu0 %1644 }
0x1dd0   :  { %v2826_v24 = vpop.eup %2825 }
0x1dd1   :  { %1640 = vrot.lane.b32.xlu1 %v2826_v24, %s3020_s25 }
0x1e43   :  { %v1641_v25 = vpop.permute.xlu1 %1640 }
0x1e44   :  { %v1643_v26 = vmul.f32 %v2824_v16, %v1641_v25 }
0x1e46   :  { %v1648_v28 = vrot.slane %v1643_v26, 3  ;;  %v1979_v8 = vrot.slane %v1643_v26, 4 }
0x1e48   :  { %v1990_v29 = vsel %vm139_vm5, %v1989_v2, %v1979_v8  ;;  %1649 = vrot.lane.b32.xlu1 %v1648_v28, %s3020_s25  ;;  %v1067_v2 = vrot.slane %v3380_v27, 7 }
0x1eba   :  { %v1650_v31 = vpop.permute.xlu1 %1649 }
0x1ebb   :  { %v1652_v32 = vsel %vm160_vm4, %v1645_v30, %v1650_v31 }
0x1ebc   :  { %v1654_v40 = vrot.slane %v1652_v32, 5 }
0x1ebe   :  { %2509 = vmatmul.mubr.msk.f32.vlgmr.msra.gmra.mrb[14].mxu0 %vm1114_vm9, %v1654_v40 }
0x1ebf   :  { %2700 = vmatpush3.bf16.msra.mxu0 %v3317_v45  ;;  %2546 = vmatprep.mubr.msk.f32.mxu0 %vm3018_vm0, %v3019_v11 }
0x1ec0   :  { %2701 = vmatprep.subr.bf16.mxu0 %v3017_v3 }
0x1ec3   :  { %2703 = vmatpush3.bf16.msra.mxu0 %v3327_v49 }
0x1ec4   :  { %2704 = vmatprep.subr.bf16.mxu0 %v3017_v3 }
0x1ec7   :  { %2706 = vmatpush3.bf16.msra.mxu0 %v3339_v52 }
0x1ec8   :  { %2707 = vmatprep.subr.bf16.mxu0 %v3017_v3 }
0x1ecb   :  { %2709 = vmatpush3.bf16.msra.mxu0 %v3349_v55 }
0x1f91   :  { %v1723_v13 = vpop.f32.mrb[14].mxu0 }
0x1f92   :  { %v1724_v34 = vadd.f32 %v1723_v13, %v3371_v63  ;;  %v2510_v35 = vpop.f32.mrb[15].mxu0 }
0x1f94   :  { %2827 = vtanh.f32 %v1724_v34  ;;  %v2169_v58 = vmul.f32 -1.442695, %v1724_v34 }
0x1f96   :  { %2829 = vpow2.f32 %v2169_v58 }
0x1f9e   :  { %v2828_v45 = vpop.eup %2827 }
0x1f9f   :  { %1736 = vrot.lane.b32.xlu0 %v2828_v45, %s3020_s25 }
0x1fa0   :  { %v2830_v38 = vpop.eup %2829 }
0x1fa1   :  { %v1730_v49 = vadd.f32 1.0, %v2830_v38 }
0x1fa3   :  { %2831 = vrcp.f32 %v1730_v49 }
0x1fad   :  { %v2832_v39 = vpop.eup %2831 }
0x1fae   :  { %v1734_v55 = vmul.f32 %v2832_v39, %v1637_v23 }
0x2011   :  { %v1737_v17 = vpop.permute.xlu0 %1736 }
0x2012   :  { %v1739_v52 = vmul.f32 %v2832_v39, %v1737_v17 }
0x2014   :  { %1741 = vrot.lane.b32.xlu1 %v1739_v52, %s3021_s26 }
0x2018   :  { %1751 = vrot.lane.b32.xlu1 %v3387_v33, %s3021_s26 }
0x2086   :  { %v1742_v36 = vpop.permute.xlu1 %1741 }
0x2087   :  { %v1744_v42 = vadd.f32 %v1742_v36, %v1734_v55 }
0x2089   :  { %2833 = vtanh.f32 %v1744_v42 }
0x208a   :  { %2835 = vtanh.f32 %v1058_v47  ;;  %v1752_v46 = vpop.permute.xlu1 %1751 }
0x208b   :  { %2837 = vpow2.f32 %v2157_v56 }
0x2093   :  { %v2834_v43 = vpop.eup %2833 }
0x2094   :  { %1747 = vrot.lane.b32.xlu0 %v2834_v43, %s3020_s25  ;;  %v2836_v54 = vpop.eup %2835  ;;  %v1995_v43 = vld [vmem:[%s3602_s8 + $0x8] sm:$0xff] }
0x2095   :  { %v2838_v57 = vpop.eup %2837 }
0x2096   :  { %v1062_v59 = vadd.f32 1.0, %v2838_v57 }
0x2098   :  { %2839 = vrcp.f32 %v1062_v59 }
0x20a2   :  { %v2840_v62 = vpop.eup %2839 }
0x20a3   :  { %v1069_v4 = vmul.f32 %v2840_v62, %v1067_v2 }
0x2106   :  { %v1748_v48 = vpop.permute.xlu0 %1747 }
0x2107   :  { %v1750_v50 = vmul.f32 %v2832_v39, %v1748_v48  ;;  %v1996_v48 = vld [vmem:[%s3602_s8 + $0x10] sm:$0xff] }
0x2109   :  { %v1755_v51 = vrot.slane %v1750_v50, 2  ;;  %v1981_v53 = vrot.slane %v1750_v50, 3  ;;  %v1997_v50 = vld [vmem:[%s3602_s8 + $0x18] sm:$0xff] }
0x210b   :  { %1756 = vrot.lane.b32.xlu0 %v1755_v51, %s3020_s25  ;;  %v1991_v33 = vsel %vm141_vm6, %v1990_v29, %v1981_v53  ;;  %v2714_v51 = vpack.c.bf16 %v1997_v50, %v1996_v48 }
0x210f   :  { %1071 = vrot.lane.b32.xlu0 %v2836_v54, %s3020_s25 }
0x217d   :  { %v1757_v60 = vpop.permute.xlu0 %1756 }
0x217e   :  { %v1759_v41 = vsel %vm160_vm4, %v1752_v46, %v1757_v60 }
0x217f   :  { %v1761_v61 = vrot.slane %v1759_v41, 6 }
0x2181   :  { %2528 = vmatmul.mubr.msk.f32.vlgmr.msra.gmra.mrb[14].mxu1 %vm1114_vm9, %v1761_v61  ;;  %v1072_v0 = vpop.permute.xlu0 %1071 }
0x2182   :  { %v1074_v1 = vmul.f32 %v2840_v62, %v1072_v0  ;;  %2557 = vmatprep.mubr.msk.f32.mxu1 %vm3018_vm0, %v3019_v11 }
0x2184   :  { %1076 = vrot.lane.b32.xlu0 %v1074_v1, %s3021_s26 }
0x21f6   :  { %v1077_v5 = vpop.permute.xlu0 %1076 }
0x21f7   :  { %v3517_v6 = vadd.f32 %v1077_v5, %v1069_v4 }
0x21f9   :  { %2841 = vtanh.f32 %v3517_v6 }
0x2203   :  { %v2842_v20 = vpop.eup %2841 }
0x2204   :  { %1082 = vrot.lane.b32.xlu0 %v2842_v20, %s3020_s25 }
0x2254   :  { %v1830_v7 = vpop.f32.mrb[14].mxu1 }
0x2255   :  { %v1831_v9 = vadd.f32 %v1830_v7, %v3371_v63  ;;  %v2529_v10 = vpop.f32.mrb[15].mxu1 }
0x2257   :  { %2843 = vtanh.f32 %v1831_v9  ;;  %v2171_v11 = vmul.f32 -1.442695, %v1831_v9 }
0x2259   :  { %2845 = vpow2.f32 %v2171_v11 }
0x2261   :  { %v2844_v12 = vpop.eup %2843 }
0x2262   :  { %1843 = vrot.lane.b32.xlu1 %v2844_v12, %s3020_s25 }
0x2263   :  { %v2846_v27 = vpop.eup %2845 }
0x2264   :  { %v1837_v37 = vadd.f32 1.0, %v2846_v27 }
0x2266   :  { %2847 = vrcp.f32 %v1837_v37 }
0x2270   :  { %v2848_v14 = vpop.eup %2847 }
0x2271   :  { %v1841_v18 = vmul.f32 %v2848_v14, %v1744_v42 }
0x2276   :  { %v1083_v23 = vpop.permute.xlu0 %1082 }
0x2277   :  { %v1085_v24 = vmul.f32 %v2840_v62, %v1083_v23 }
0x22d4   :  { %v1844_v15 = vpop.permute.xlu1 %1843 }
0x22d5   :  { %v1846_v16 = vmul.f32 %v2848_v14, %v1844_v15 }
0x22d7   :  { %1848 = vrot.lane.b32.xlu1 %v1846_v16, %s3021_s26 }
0x2349   :  { %v1849_v19 = vpop.permute.xlu1 %1848 }
0x234a   :  { %v1851_v21 = vadd.f32 %v1849_v19, %v1841_v18 }
0x234c   :  { %2849 = vtanh.f32 %v1851_v21 }
0x2356   :  { %v2850_v22 = vpop.eup %2849 }
0x2357   :  { %1854 = vrot.lane.b32.xlu1 %v2850_v22, %s3020_s25 }
0x235b   :  { %1087 = vrot.lane.b32.xlu1 %v1085_v24, %s3021_s26 }
0x23c9   :  { %v1855_v25 = vpop.permute.xlu1 %1854 }
0x23ca   :  { %v1857_v26 = vmul.f32 %v2848_v14, %v1855_v25 }
0x23cc   :  { %v1859_v28 = vrot.slane %v1857_v26, 1  ;;  %v1983_v8 = vrot.slane %v1857_v26, 2 }
0x23cd   :  { %v1088_v29 = vpop.permute.xlu1 %1087 }
0x23ce   :  { %1860 = vrot.lane.b32.xlu0 %v1859_v28, %s3020_s25  ;;  %v1992_v30 = vsel %vm143_vm7, %v1991_v33, %v1983_v8  ;;  %1091 = vst.msk [vmem:[#allocation11 - $0x7] sm:$0x80] %vm1090_vm10, %v1088_v29 }
0x2440   :  { %v1861_v31 = vpop.permute.xlu0 %1860 }
0x2441   :  { %v1863_v32 = vsel %vm160_vm4, %v1088_v29, %v1861_v31 }
0x2442   :  { %v1865_v40 = vrot.slane %v1863_v32, 7 }
0x2444   :  { %2547 = vmatmul.mubr.msk.f32.vlgmr.msra.gmra.mrb[16].mxu0 %vm1114_vm9, %v1865_v40 }
0x2517   :  { %v1934_v13 = vpop.f32.mrb[16].mxu0 }
0x2518   :  { %v1935_v34 = vadd.f32 %v1934_v13, %v3371_v63  ;;  %v2548_v35 = vpop.f32.mrb[17].mxu0  ;;  %v1994_v63 = vld [vmem:[%s3602_s8] sm:$0xff]  ;;  %s3023_s8 = smov [#allocation11]  }
0x2519   :  { %v2711_v44 = vpack.c.bf16 %v1995_v43, %v1994_v63  ;;  %s2097_s24 = sshll.u32 %s3023_s8, 4  ;;  %s2098_s24 = int_to_ptr.vmem [resolvable:$true] %s2097_s24 }
0x251a   :  { %2851 = vtanh.f32 %v1935_v34  ;;  %v2173_v58 = vmul.f32 -1.442695, %v1935_v34  ;;  %s2935_s30 = scalar_lea.vmem %s2098_s24, 32  ;;  %p2940_p0 = scmp.lt.s32.totalorder %s2098_s24, %s2098_s24 }
0x251b   :  { %2712 = vmatpush3.bf16.msra.mxu1 %v2711_v44  ;;  %p2936_p13 = scmp.ne.s32.totalorder %s2098_s24, %s2935_s30  ;;  %p2941_p1 = scmp.lt.s32.totalorder %s2935_s30, %s2935_s30 }
0x251c   :  { %2853 = vpow2.f32 %v2173_v58  ;;  %2713 = vmatprep.subr.bf16.mxu1 %v3017_v3 }
0x251d   :  { %p2942_p2 = por %p2941_p1, %p2940_p0 }
0x251f   :  { %2715 = vmatpush3.bf16.msra.mxu1 %v2714_v51  ;;  %p2943_p3 = pnand %p2942_p2, %p2936_p13 }
0x2524   :  { %v2852_v45 = vpop.eup %2851 }
0x2525   :  { %1947 = vrot.lane.b32.xlu1 %v2852_v45, %s3020_s25 }
0x2526   :  { %v2854_v38 = vpop.eup %2853 }
0x2527   :  { %v1941_v49 = vadd.f32 1.0, %v2854_v38 }
0x2529   :  { %2855 = vrcp.f32 %v1941_v49 }
0x2533   :  { %v2856_v39 = vpop.eup %2855 }
0x2534   :  { %v1945_v55 = vmul.f32 %v2856_v39, %v1851_v21 }
0x2597   :  { %v1948_v17 = vpop.permute.xlu1 %1947 }
0x2598   :  { %v1950_v52 = vmul.f32 %v2856_v39, %v1948_v17 }
0x259a   :  { %1952 = vrot.lane.b32.xlu0 %v1950_v52, %s3021_s26 }
0x260c   :  { %v1953_v36 = vpop.permute.xlu0 %1952 }
0x260d   :  { %v1955_v42 = vadd.f32 %v1953_v36, %v1945_v55 }
0x260f   :  { %2857 = vtanh.f32 %v1955_v42 }
0x2619   :  { %v2858_v47 = vpop.eup %2857 }
0x261a   :  { %1958 = vrot.lane.b32.xlu1 %v2858_v47, %s3020_s25  ;;  %s3022_s25 = smov 96  }
0x268c   :  { %v1959_v53 = vpop.permute.xlu1 %1958 }
0x268d   :  { %v1961_v33 = vmul.f32 %v2856_v39, %v1959_v53 }
0x268f   :  { %v1985_v54 = vrot.slane %v1961_v33, 1  ;;  %1963 = vrot.lane.b32.xlu1 %v1961_v33, %s3021_s26 }
0x2691   :  { %v1993_v56 = vsel %vm145_vm8, %v1992_v30, %v1985_v54 }
0x2692   :  { %2006 = vrot.lane.b32.xlu0 %v1993_v56, %s3021_s26 }
0x2693   :  { %1969 = vrot.lane.b32.xlu1 %v1955_v42, %s3022_s25 }
0x2696   :  { %1093 = vrot.lane.b32.xlu0 %v3517_v6, %s3022_s25 }
0x2701   :  { %v1964_v3 = vpop.permute.xlu1 %1963 }
0x2702   :  { %1967 = vst.msk [vmem:[#allocation11 + $0x1] sm:$0x1] %vm1966_vm11, %v1964_v3 }
0x2704   :  { %v2007_v57 = vpop.permute.xlu0 %2006 }
0x2705   :  { %v1970_v59 = vpop.permute.xlu1 %1969  ;;  %2558 = vmatmul.mubr.msk.f32.vlgmr.msra.gmra.mrb[16].mxu1 %vm160_vm4, %v2007_v57 }
0x2706   :  { %1972 = vst.msk [vmem:[#allocation13 + $0x1] sm:$0x1] %vm1966_vm11, %v1970_v59 }
0x2708   :  { %v1094_v46 = vpop.permute.xlu0 %1093 }
0x2709   :  { %1096 = vst.msk [vmem:[#allocation13 - $0x7] sm:$0x80] %vm1090_vm10, %v1094_v46 }
0x270a   :  { %2946 = shalt.err (!%p2943_p3)
}
0x270b   :  { %s2947_s14 = scalar_lea.hbm %s3605_s11, 32 }
0x270c   :  { %p2948_p4 = scmp.ne.s32.totalorder %s3605_s11, %s2947_s14  ;;  %p2951_p5 = scmp.lt.u32.totalorder %s2947_s14, %s3605_s11 }
0x270e   :  { %p2953_p6 = pnand %p2951_p5, %p2948_p4 }
0x2710   :  { %2956 = shalt.err (!%p2953_p6)
}
0x2711   :  { %2100 = dma.vmem_to_hbm [thread:$0]  %s2098_s24, 32, %s3605_s11, [#allocation12]  }
0x2712   :  { %s3024_s19 = smov [#allocation13]  }
0x2713   :  { %s2107_s20 = sshll.u32 %s3024_s19, 4  ;;  %s2108_s20 = int_to_ptr.vmem [resolvable:$true] %s2107_s20 }
0x2714   :  { %s2957_s27 = scalar_lea.vmem %s2108_s20, 32  ;;  %p2962_p8 = scmp.lt.s32.totalorder %s2108_s20, %s2108_s20 }
0x2715   :  { %p2958_p7 = scmp.ne.s32.totalorder %s2108_s20, %s2957_s27  ;;  %p2963_p9 = scmp.lt.s32.totalorder %s2957_s27, %s2957_s27 }
0x2717   :  { %p2964_p10 = por %p2963_p9, %p2962_p8 }
0x2719   :  { %p2965_p11 = pnand %p2964_p10, %p2958_p7 }
0x271b   :  { %2968 = shalt.err (!%p2965_p11)
}
0x271c   :  { %s2969_s6 = scalar_lea.hbm %s3606_s12, 32 }
0x271d   :  { %p2970_p12 = scmp.ne.s32.totalorder %s3606_s12, %s2969_s6  ;;  %p2973_p13 = scmp.lt.u32.totalorder %s2969_s6, %s3606_s12 }
0x271f   :  { %p2975_p0 = pnand %p2973_p13, %p2970_p12 }
0x2721   :  { %2978 = shalt.err (!%p2975_p0)
}
0x2722   :  { %2110 = dma.vmem_to_hbm [thread:$0]  %s2108_s20, 32, %s3606_s12, [#allocation12]   ;;  %v2174_v60 = vld [vmem:[%s3603_s9] ss:$0 sm:$0xff] }
0x2723   :  { %s3025_s3 = smov [#allocation10]  }
0x2724   :  { %s2087_s25 = sshll.u32 %s3025_s3, 4  ;;  %s2088_s25 = int_to_ptr.vmem [resolvable:$true] %s2087_s25 }
0x2725   :  { %s2979_s8 = scalar_lea.vmem %s2088_s25, 128  ;;  %p2984_p2 = scmp.lt.s32.totalorder %s2088_s25, %s2088_s25 }
0x2726   :  { %p2980_p1 = scmp.ne.s32.totalorder %s2088_s25, %s2979_s8  ;;  %p2985_p3 = scmp.lt.s32.totalorder %s2979_s8, %s2979_s8 }
0x2728   :  { %p2986_p4 = por %p2985_p3, %p2984_p2 }
0x272a   :  { %p2987_p5 = pnand %p2986_p4, %p2980_p1 }
0x27d8   :  { %v2076_v41 = vpop.f32.mrb[16].mxu1 }
0x27d9   :  { %v2077_v61 = vadd.f32 %v2174_v60, %v2076_v41  ;;  %v2559_v62 = vpop.f32.mrb[17].mxu1 }
0x27db   :  { %2080 = vst.msk [vmem:[#allocation10] sm:$0xff] %vm1114_vm9, %v2077_v61 }
0x27dc   :  { %2990 = shalt.err (!%p2987_p5)
}
0x27dd   :  { %s2991_s30 = scalar_lea.hbm %s3604_s10, 128 }
0x27de   :  { %p2992_p6 = scmp.ne.s32.totalorder %s3604_s10, %s2991_s30  ;;  %p2995_p7 = scmp.lt.u32.totalorder %s2991_s30, %s3604_s10 }
0x27e0   :  { %p2997_p8 = pnand %p2995_p7, %p2992_p6 }
0x27e2   :  { %3000 = shalt.err (!%p2997_p8)
}
0x27e3   :  { %2090 = dma.vmem_to_hbm [thread:$0]  %s2088_s25, 128, %s3604_s10, [#allocation4]  }
0x27e4   :  { %3007 = dma.done.wait [#allocation4], 128  }
0x27e5   :  { %3008 = vsyncadd [#allocation4], 4294967168 }
0x27e6   :  { %3009 = dma.done.wait [#allocation12], 64  }
0x27e7   :  { %3010 = vsyncadd [#allocation12], 4294967232 }
0x27e8   :  { %2120 = vsyncpa [#allocation3], 1 }
0x27e9   :  { %2121 = vsyncpa [#allocation8], 1 }
0x27ea   :  { %2122 = vsyncpa [#allocation4], 1 }
0x27eb   :  { %2123 = vsyncpa [#allocation12], 1 }
0x27ec   :  { %2124 = vsyncpa [#allocation5], 1 }

</bundles_post_ra>
